<compile_context>
chip_gen: v7x
topology: tpu7x:2x2x1
jax: 0.10.0
libtpu: 0.0.40
codegen_flags: <defaults>
</compile_context>

<pallas_src>
import functools

import jax
import jax.numpy as jnp
from jax.experimental import pallas as pl
from jax.experimental.pallas import tpu as pltpu

SUBLANE = 8  # f32 sublane width (second-to-last vreg dim)


def _round_up(n, m):
    return ((n + m - 1) // m) * m


def _make_mlp_kernel(num_hidden_layers, compute_dtype):
    """tanh(x W_in + b_in) -> [tanh(. W_h + b_h)]*L -> . W_out + b_out."""

    def kernel(x_ref, *refs):
        # refs: w_in, b_in, (w_h, b_h)*num_hidden_layers, w_out, b_out, out_ref
        out_ref = refs[-1]
        p = refs[:-1]

        w_in, b_in = p[0], p[1]
        h = jnp.tanh(
            jnp.dot(x_ref[...].astype(compute_dtype), w_in[...],
                    preferred_element_type=jnp.float32)
            + b_in[...]
        )

        idx = 2
        for _ in range(num_hidden_layers):
            w, b = p[idx], p[idx + 1]
            idx += 2
            h = jnp.tanh(
                jnp.dot(h.astype(compute_dtype), w[...],
                        preferred_element_type=jnp.float32)
                + b[...]
            )

        w_out, b_out = p[idx], p[idx + 1]
        y = jnp.dot(h.astype(compute_dtype), w_out[...],
                    preferred_element_type=jnp.float32) + b_out[...]
        out_ref[...] = y.astype(out_ref.dtype)

    return kernel


def prepare_params(params, *, compute_dtype=jnp.float32, feature_lane=128):
    """One-time packing of PyTorch-convention (out,in) weights.

    Returns (flat_params, meta): weights transposed to (in, out), hidden/output
    feature dims zero-padded to `feature_lane`, weights cast to compute_dtype,
    biases kept f32 as (1, out_p) rows.  The first layer's K dim stays equal to
    the true input_sz so x needs no feature padding.
    """
    n_layers = len(params)
    input_sz = params[0][0].shape[1]
    num_actions = params[-1][0].shape[0]

    flat = []
    layer_dims = []          # (K_padded, N_padded) per layer, for cost estimate
    prev_p = input_sz        # first-layer K is unpadded
    for li, (w, b) in enumerate(params):
        w = jnp.asarray(w, jnp.float32)
        b = jnp.asarray(b, jnp.float32)
        out_dim = w.shape[0]
        out_dim_p = _round_up(out_dim, feature_lane)
        w_t = (jnp.zeros((prev_p, out_dim_p), jnp.float32)
               .at[: w.shape[1], :out_dim].set(w.T))
        b_row = jnp.zeros((1, out_dim_p), jnp.float32).at[0, :out_dim].set(b)
        flat.append(w_t.astype(compute_dtype))  # weights in compute dtype
        flat.append(b_row)                      # biases stay f32 (f32 acc add)
        layer_dims.append((prev_p, out_dim_p))
        prev_p = out_dim_p

    meta = dict(
        num_hidden_layers=n_layers - 2,
        input_sz=input_sz,
        num_actions=num_actions,
        act_p=layer_dims[-1][1],
        layer_dims=tuple(layer_dims),
        compute_dtype=compute_dtype,
    )
    return flat, meta


def dqn_mlp_forward(x, packed_params, meta, *, batch_tile=512):
    """Fused MLP forward.  packed_params/meta come from prepare_params()."""
    compute_dtype = meta["compute_dtype"]
    input_sz = meta["input_sz"]
    num_actions = meta["num_actions"]
    act_p = meta["act_p"]

    x = jnp.asarray(x)
    B = x.shape[0]
    assert x.shape[1] == input_sz

    # Batch tile: multiple of the sublane width, never larger than padded B.
    TB = min(_round_up(batch_tile, SUBLANE), _round_up(B, SUBLANE))
    B_p = _round_up(B, TB)
    grid = (B_p // TB,)

    # Only pad along the batch dim (cheap); the feature dim stays unpadded
    # because the x BlockSpec's last dim equals the full array dim.
    if B_p != B:
        x = jnp.zeros((B_p, input_sz), x.dtype).at[:B].set(x)

    def _batch_map(i):
        return (i, 0)

    def _resident_map(i, *, nd):
        return (0,) * nd

    def _build_in_specs(single_buffer_params):
        specs = [pl.BlockSpec((TB, input_sz), _batch_map)]
        for a in packed_params:
            idx_map = functools.partial(_resident_map, nd=a.ndim)
            if single_buffer_params:
                # Resident params never re-DMA -> one buffer is enough.
                specs.append(pl.BlockSpec(a.shape, idx_map,
                                          pipeline_mode=pl.Buffered(1)))
            else:
                specs.append(pl.BlockSpec(a.shape, idx_map))
        return specs

    out_spec = pl.BlockSpec((TB, act_p), _batch_map)

    # Scheduler hint (padded dims; advisory only).
    flops = 0
    transcendentals = 0
    for li, (k, n) in enumerate(meta["layer_dims"]):
        flops += 2 * B_p * k * n
        if li < len(meta["layer_dims"]) - 1:
            transcendentals += B_p * n
    param_bytes = sum(int(a.size) * a.dtype.itemsize for a in packed_params)
    bytes_accessed = int(x.size * x.dtype.itemsize + param_bytes + B_p * act_p * 4)
    cost = pl.CostEstimate(flops=int(flops),
                           transcendentals=int(transcendentals),
                           bytes_accessed=bytes_accessed)

    # VMEM budget: single-buffered params + double-buffered x/out tiles + slack,
    # capped below the chip's physical VMEM.
    x_tile_bytes = TB * input_sz * x.dtype.itemsize
    out_tile_bytes = TB * act_p * 4
    needed = param_bytes + 2 * (x_tile_bytes + out_tile_bytes) + (4 << 20)
    try:
        vmem_cap = int(pltpu.get_tpu_info().vmem_capacity_bytes)
    except Exception:
        vmem_cap = 64 << 20  # conservative (v7x per-core)
    vmem_limit = int(min(max(needed, 32 << 20), vmem_cap * 7 // 8))

    kernel = _make_mlp_kernel(meta["num_hidden_layers"], compute_dtype)

    def _run(single_buffer_params):
        return pl.pallas_call(
            kernel,
            out_shape=jax.ShapeDtypeStruct((B_p, act_p), jnp.float32),
            grid=grid,
            in_specs=_build_in_specs(single_buffer_params),
            out_specs=out_spec,
            compiler_params=pltpu.CompilerParams(
                dimension_semantics=("parallel",),
                vmem_limit_bytes=vmem_limit),
            cost_estimate=cost,
        )(x, *packed_params)

    try:
        y_p = _run(True)
    except Exception:
        # Fallback for JAX builds that reject single-buffered pipeline_mode.
        y_p = _run(False)

    # Slice back to the logical output shape.
    return y_p[:B, :num_actions]


# --------------------------------------------------------------------------
# Reference setup (deterministic analogue of init_normc_ + DQNMLPBase.forward)
# --------------------------------------------------------------------------
def init_normc(key, out_features, in_features):
    w = jax.random.normal(key, (out_features, in_features), dtype=jnp.float32)
    w = w / jnp.sqrt(jnp.sum(w * w, axis=1, keepdims=True))
    b = jnp.zeros((out_features,), dtype=jnp.float32)
    return w, b


def build_params(key, input_sz, hid_sz, num_actions, num_layer):
    assert num_layer >= 1
    keys = jax.random.split(key, num_layer + 1)
    params = [init_normc(keys[0], hid_sz, input_sz)]                 # in_fc
    for i in range(num_layer - 1):                                   # hid_layers
        params.append(init_normc(keys[1 + i], hid_sz, hid_sz))
    params.append(init_normc(keys[num_layer], num_actions, hid_sz))  # out_fc
    return params


def reference_forward(x, params):
    h = x
    for i, (w, b) in enumerate(params):
        h = h @ w.T + b
        if i < len(params) - 1:
            h = jnp.tanh(h)
    return h


if __name__ == "__main__":
    # Small deterministic config consistent with DQNMLPBase.forward.
    batch = 64
    input_sz = 16
    hid_sz = 32
    num_actions = 4
    num_layer = 3  # => 2 hidden Linear layers between in_fc and out_fc

    key = jax.random.PRNGKey(0)
    k_x, k_p = jax.random.split(key)

    x = jax.random.normal(k_x, (batch, input_sz), dtype=jnp.float32)
    params = build_params(k_p, input_sz, hid_sz, num_actions, num_layer)
    ref = reference_forward(x, params)

    # f32 path (numerically exact padding): batch_tile=32 -> 2 grid steps,
    # exercising the pipelined batch grid.
    packed_f32, meta_f32 = prepare_params(params, compute_dtype=jnp.float32)
    out = dqn_mlp_forward(x, packed_f32, meta_f32, batch_tile=32)
    out = jax.block_until_ready(out)
    assert out.shape == (batch, num_actions)
    assert jnp.allclose(out, ref, atol=1e-5, rtol=1e-5), "f32 mismatch vs reference"

    # bf16 weights/activations with f32 MXU accumulation (v6e/v7x fast path):
    # looser tolerance since x/h are quantized before each matmul.
    packed_bf16, meta_bf16 = prepare_params(params, compute_dtype=jnp.bfloat16)
    out_bf16 = dqn_mlp_forward(x, packed_bf16, meta_bf16, batch_tile=32)
    out_bf16 = jax.block_until_ready(out_bf16)
    assert jnp.allclose(out_bf16, ref, atol=5e-2, rtol=5e-2), "bf16 mismatch vs reference"

    print("KERNEL_OK")
</pallas_src>

<mosaic_0001>
module attributes {stable_mosaic.version = 11 : i64} {
  func.func @kernel(%arg0: i32, %arg1: memref<32x16xf32, #tpu.memory_space<vmem>>, %arg2: memref<16x128xf32, #tpu.memory_space<vmem>>, %arg3: memref<1x128xf32, #tpu.memory_space<vmem>>, %arg4: memref<128x128xf32, #tpu.memory_space<vmem>>, %arg5: memref<1x128xf32, #tpu.memory_space<vmem>>, %arg6: memref<128x128xf32, #tpu.memory_space<vmem>>, %arg7: memref<1x128xf32, #tpu.memory_space<vmem>>, %arg8: memref<128x128xf32, #tpu.memory_space<vmem>>, %arg9: memref<1x128xf32, #tpu.memory_space<vmem>>, %arg10: memref<32x128xf32, #tpu.memory_space<vmem>>) attributes {dimension_semantics = [#tpu.dimension_semantics<parallel>], iteration_bounds = array<i64: 2>, scalar_prefetch = 0 : i64, scratch_operands = 0 : i64, tpu.core_type = #tpu.core_type<tc>, window_params = [{transform_indices = @transform_0, window_bounds = array<i64: 32, 16>}, {pipeline_mode = #tpu.pipeline_mode<synchronous>, transform_indices = @transform_1, window_bounds = array<i64: 16, 128>}, {pipeline_mode = #tpu.pipeline_mode<synchronous>, transform_indices = @transform_2, window_bounds = array<i64: 1, 128>}, {pipeline_mode = #tpu.pipeline_mode<synchronous>, transform_indices = @transform_3, window_bounds = array<i64: 128, 128>}, {pipeline_mode = #tpu.pipeline_mode<synchronous>, transform_indices = @transform_4, window_bounds = array<i64: 1, 128>}, {pipeline_mode = #tpu.pipeline_mode<synchronous>, transform_indices = @transform_5, window_bounds = array<i64: 128, 128>}, {pipeline_mode = #tpu.pipeline_mode<synchronous>, transform_indices = @transform_6, window_bounds = array<i64: 1, 128>}, {pipeline_mode = #tpu.pipeline_mode<synchronous>, transform_indices = @transform_7, window_bounds = array<i64: 128, 128>}, {pipeline_mode = #tpu.pipeline_mode<synchronous>, transform_indices = @transform_8, window_bounds = array<i64: 1, 128>}, {transform_indices = @transform_9, window_bounds = array<i64: 32, 128>}]} {
    %c0 = arith.constant 0 : index
    %c0_0 = arith.constant 0 : index
    %0 = vector.load %arg1[%c0, %c0_0] : memref<32x16xf32, #tpu.memory_space<vmem>>, vector<32x16xf32>
    %c0_1 = arith.constant 0 : index
    %c0_2 = arith.constant 0 : index
    %1 = vector.load %arg2[%c0_1, %c0_2] : memref<16x128xf32, #tpu.memory_space<vmem>>, vector<16x128xf32>
    %cst = arith.constant dense<0.000000e+00> : vector<32x128xf32>
    %2 = tpu.matmul %0, %1, %cst {dimension_numbers = #tpu.dot_dimension_numbers<[1], [0], [0], [1], [0, 0, 1, 1], [], []>} : vector<32x16xf32>, vector<16x128xf32>, vector<32x128xf32> -> vector<32x128xf32>
    %c0_3 = arith.constant 0 : index
    %c0_4 = arith.constant 0 : index
    %3 = vector.load %arg3[%c0_3, %c0_4] : memref<1x128xf32, #tpu.memory_space<vmem>>, vector<1x128xf32>
    %4 = vector.broadcast %3 : vector<1x128xf32> to vector<32x128xf32>
    %5 = arith.addf %2, %4 : vector<32x128xf32>
    %6 = math.tanh %5 : vector<32x128xf32>
    %c0_5 = arith.constant 0 : index
    %c0_6 = arith.constant 0 : index
    %7 = vector.load %arg4[%c0_5, %c0_6] : memref<128x128xf32, #tpu.memory_space<vmem>>, vector<128x128xf32>
    %cst_7 = arith.constant dense<0.000000e+00> : vector<32x128xf32>
    %8 = tpu.matmul %6, %7, %cst_7 {dimension_numbers = #tpu.dot_dimension_numbers<[1], [0], [0], [1], [0, 0, 1, 1], [], []>} : vector<32x128xf32>, vector<128x128xf32>, vector<32x128xf32> -> vector<32x128xf32>
    %c0_8 = arith.constant 0 : index
    %c0_9 = arith.constant 0 : index
    %9 = vector.load %arg5[%c0_8, %c0_9] : memref<1x128xf32, #tpu.memory_space<vmem>>, vector<1x128xf32>
    %10 = vector.broadcast %9 : vector<1x128xf32> to vector<32x128xf32>
    %11 = arith.addf %8, %10 : vector<32x128xf32>
    %12 = math.tanh %11 : vector<32x128xf32>
    %c0_10 = arith.constant 0 : index
    %c0_11 = arith.constant 0 : index
    %13 = vector.load %arg6[%c0_10, %c0_11] : memref<128x128xf32, #tpu.memory_space<vmem>>, vector<128x128xf32>
    %cst_12 = arith.constant dense<0.000000e+00> : vector<32x128xf32>
    %14 = tpu.matmul %12, %13, %cst_12 {dimension_numbers = #tpu.dot_dimension_numbers<[1], [0], [0], [1], [0, 0, 1, 1], [], []>} : vector<32x128xf32>, vector<128x128xf32>, vector<32x128xf32> -> vector<32x128xf32>
    %c0_13 = arith.constant 0 : index
    %c0_14 = arith.constant 0 : index
    %15 = vector.load %arg7[%c0_13, %c0_14] : memref<1x128xf32, #tpu.memory_space<vmem>>, vector<1x128xf32>
    %16 = vector.broadcast %15 : vector<1x128xf32> to vector<32x128xf32>
    %17 = arith.addf %14, %16 : vector<32x128xf32>
    %18 = math.tanh %17 : vector<32x128xf32>
    %c0_15 = arith.constant 0 : index
    %c0_16 = arith.constant 0 : index
    %19 = vector.load %arg8[%c0_15, %c0_16] : memref<128x128xf32, #tpu.memory_space<vmem>>, vector<128x128xf32>
    %cst_17 = arith.constant dense<0.000000e+00> : vector<32x128xf32>
    %20 = tpu.matmul %18, %19, %cst_17 {dimension_numbers = #tpu.dot_dimension_numbers<[1], [0], [0], [1], [0, 0, 1, 1], [], []>} : vector<32x128xf32>, vector<128x128xf32>, vector<32x128xf32> -> vector<32x128xf32>
    %c0_18 = arith.constant 0 : index
    %c0_19 = arith.constant 0 : index
    %21 = vector.load %arg9[%c0_18, %c0_19] : memref<1x128xf32, #tpu.memory_space<vmem>>, vector<1x128xf32>
    %22 = vector.broadcast %21 : vector<1x128xf32> to vector<32x128xf32>
    %23 = arith.addf %20, %22 : vector<32x128xf32>
    %c0_20 = arith.constant 0 : index
    %c0_21 = arith.constant 0 : index
    %24 = vector.load %arg10[%c0_20, %c0_21] : memref<32x128xf32, #tpu.memory_space<vmem>>, vector<32x128xf32>
    tpu.vector_store %arg10[%c0_20, %c0_21], %23 {strides = array<i32>} : memref<32x128xf32, #tpu.memory_space<vmem>>, vector<32x128xf32>,
    return
  }
  func.func @transform_0(%arg0: i32) -> (i32, i32) {
    %c0_i32 = arith.constant 0 : i32
    %c0_i32_0 = arith.constant 0 : i32
    return %arg0, %c0_i32 : i32, i32
  }
  func.func @transform_1(%arg0: i32) -> (i32, i32) {
    %c0_i32 = arith.constant 0 : i32
    %c0_i32_0 = arith.constant 0 : i32
    %c0_i32_1 = arith.constant 0 : i32
    return %c0_i32, %c0_i32_0 : i32, i32
  }
  func.func @transform_2(%arg0: i32) -> (i32, i32) {
    %c0_i32 = arith.constant 0 : i32
    %c0_i32_0 = arith.constant 0 : i32
    %c0_i32_1 = arith.constant 0 : i32
    return %c0_i32, %c0_i32_0 : i32, i32
  }
  func.func @transform_3(%arg0: i32) -> (i32, i32) {
    %c0_i32 = arith.constant 0 : i32
    %c0_i32_0 = arith.constant 0 : i32
    %c0_i32_1 = arith.constant 0 : i32
    return %c0_i32, %c0_i32_0 : i32, i32
  }
  func.func @transform_4(%arg0: i32) -> (i32, i32) {
    %c0_i32 = arith.constant 0 : i32
    %c0_i32_0 = arith.constant 0 : i32
    %c0_i32_1 = arith.constant 0 : i32
    return %c0_i32, %c0_i32_0 : i32, i32
  }
  func.func @transform_5(%arg0: i32) -> (i32, i32) {
    %c0_i32 = arith.constant 0 : i32
    %c0_i32_0 = arith.constant 0 : i32
    %c0_i32_1 = arith.constant 0 : i32
    return %c0_i32, %c0_i32_0 : i32, i32
  }
  func.func @transform_6(%arg0: i32) -> (i32, i32) {
    %c0_i32 = arith.constant 0 : i32
    %c0_i32_0 = arith.constant 0 : i32
    %c0_i32_1 = arith.constant 0 : i32
    return %c0_i32, %c0_i32_0 : i32, i32
  }
  func.func @transform_7(%arg0: i32) -> (i32, i32) {
    %c0_i32 = arith.constant 0 : i32
    %c0_i32_0 = arith.constant 0 : i32
    %c0_i32_1 = arith.constant 0 : i32
    return %c0_i32, %c0_i32_0 : i32, i32
  }
  func.func @transform_8(%arg0: i32) -> (i32, i32) {
    %c0_i32 = arith.constant 0 : i32
    %c0_i32_0 = arith.constant 0 : i32
    %c0_i32_1 = arith.constant 0 : i32
    return %c0_i32, %c0_i32_0 : i32, i32
  }
  func.func @transform_9(%arg0: i32) -> (i32, i32) {
    %c0_i32 = arith.constant 0 : i32
    %c0_i32_0 = arith.constant 0 : i32
    return %arg0, %c0_i32 : i32, i32
  }
}

module attributes {stable_mosaic.version = 11 : i64} {
  func.func @kernel(%arg0: i32, %arg1: memref<32x16xf32, #tpu.memory_space<vmem>>, %arg2: memref<16x128xf32, #tpu.memory_space<vmem>>, %arg3: memref<1x128xf32, #tpu.memory_space<vmem>>, %arg4: memref<128x128xf32, #tpu.memory_space<vmem>>, %arg5: memref<1x128xf32, #tpu.memory_space<vmem>>, %arg6: memref<128x128xf32, #tpu.memory_space<vmem>>, %arg7: memref<1x128xf32, #tpu.memory_space<vmem>>, %arg8: memref<128x128xf32, #tpu.memory_space<vmem>>, %arg9: memref<1x128xf32, #tpu.memory_space<vmem>>, %arg10: memref<32x128xf32, #tpu.memory_space<vmem>>) attributes {dimension_semantics = [#tpu.dimension_semantics<parallel>], iteration_bounds = array<i64: 2>, scalar_prefetch = 0 : i64, scratch_operands = 0 : i64, tpu.core_type = #tpu.core_type<tc>, window_params = [{transform_indices = @transform_0, window_bounds = array<i64: 32, 16>}, {pipeline_mode = #tpu.pipeline_mode<synchronous>, transform_indices = @transform_1, window_bounds = array<i64: 16, 128>}, {pipeline_mode = #tpu.pipeline_mode<synchronous>, transform_indices = @transform_2, window_bounds = array<i64: 1, 128>}, {pipeline_mode = #tpu.pipeline_mode<synchronous>, transform_indices = @transform_3, window_bounds = array<i64: 128, 128>}, {pipeline_mode = #tpu.pipeline_mode<synchronous>, transform_indices = @transform_4, window_bounds = array<i64: 1, 128>}, {pipeline_mode = #tpu.pipeline_mode<synchronous>, transform_indices = @transform_5, window_bounds = array<i64: 128, 128>}, {pipeline_mode = #tpu.pipeline_mode<synchronous>, transform_indices = @transform_6, window_bounds = array<i64: 1, 128>}, {pipeline_mode = #tpu.pipeline_mode<synchronous>, transform_indices = @transform_7, window_bounds = array<i64: 128, 128>}, {pipeline_mode = #tpu.pipeline_mode<synchronous>, transform_indices = @transform_8, window_bounds = array<i64: 1, 128>}, {transform_indices = @transform_9, window_bounds = array<i64: 32, 128>}]} {
    %c0 = arith.constant 0 : index
    %c0_0 = arith.constant 0 : index
    %0 = vector.load %arg1[%c0, %c0_0] : memref<32x16xf32, #tpu.memory_space<vmem>>, vector<32x16xf32>
    %c0_1 = arith.constant 0 : index
    %c0_2 = arith.constant 0 : index
    %1 = vector.load %arg2[%c0_1, %c0_2] : memref<16x128xf32, #tpu.memory_space<vmem>>, vector<16x128xf32>
    %cst = arith.constant dense<0.000000e+00> : vector<32x128xf32>
    %2 = tpu.matmul %0, %1, %cst {dimension_numbers = #tpu.dot_dimension_numbers<[1], [0], [0], [1], [0, 0, 1, 1], [], []>} : vector<32x16xf32>, vector<16x128xf32>, vector<32x128xf32> -> vector<32x128xf32>
    %c0_3 = arith.constant 0 : index
    %c0_4 = arith.constant 0 : index
    %3 = vector.load %arg3[%c0_3, %c0_4] : memref<1x128xf32, #tpu.memory_space<vmem>>, vector<1x128xf32>
    %4 = vector.broadcast %3 : vector<1x128xf32> to vector<32x128xf32>
    %5 = arith.addf %2, %4 : vector<32x128xf32>
    %6 = math.tanh %5 : vector<32x128xf32>
    %c0_5 = arith.constant 0 : index
    %c0_6 = arith.constant 0 : index
    %7 = vector.load %arg4[%c0_5, %c0_6] : memref<128x128xf32, #tpu.memory_space<vmem>>, vector<128x128xf32>
    %cst_7 = arith.constant dense<0.000000e+00> : vector<32x128xf32>
    %8 = tpu.matmul %6, %7, %cst_7 {dimension_numbers = #tpu.dot_dimension_numbers<[1], [0], [0], [1], [0, 0, 1, 1], [], []>} : vector<32x128xf32>, vector<128x128xf32>, vector<32x128xf32> -> vector<32x128xf32>
    %c0_8 = arith.constant 0 : index
    %c0_9 = arith.constant 0 : index
    %9 = vector.load %arg5[%c0_8, %c0_9] : memref<1x128xf32, #tpu.memory_space<vmem>>, vector<1x128xf32>
    %10 = vector.broadcast %9 : vector<1x128xf32> to vector<32x128xf32>
    %11 = arith.addf %8, %10 : vector<32x128xf32>
    %12 = math.tanh %11 : vector<32x128xf32>
    %c0_10 = arith.constant 0 : index
    %c0_11 = arith.constant 0 : index
    %13 = vector.load %arg6[%c0_10, %c0_11] : memref<128x128xf32, #tpu.memory_space<vmem>>, vector<128x128xf32>
    %cst_12 = arith.constant dense<0.000000e+00> : vector<32x128xf32>
    %14 = tpu.matmul %12, %13, %cst_12 {dimension_numbers = #tpu.dot_dimension_numbers<[1], [0], [0], [1], [0, 0, 1, 1], [], []>} : vector<32x128xf32>, vector<128x128xf32>, vector<32x128xf32> -> vector<32x128xf32>
    %c0_13 = arith.constant 0 : index
    %c0_14 = arith.constant 0 : index
    %15 = vector.load %arg7[%c0_13, %c0_14] : memref<1x128xf32, #tpu.memory_space<vmem>>, vector<1x128xf32>
    %16 = vector.broadcast %15 : vector<1x128xf32> to vector<32x128xf32>
    %17 = arith.addf %14, %16 : vector<32x128xf32>
    %18 = math.tanh %17 : vector<32x128xf32>
    %c0_15 = arith.constant 0 : index
    %c0_16 = arith.constant 0 : index
    %19 = vector.load %arg8[%c0_15, %c0_16] : memref<128x128xf32, #tpu.memory_space<vmem>>, vector<128x128xf32>
    %cst_17 = arith.constant dense<0.000000e+00> : vector<32x128xf32>
    %20 = tpu.matmul %18, %19, %cst_17 {dimension_numbers = #tpu.dot_dimension_numbers<[1], [0], [0], [1], [0, 0, 1, 1], [], []>} : vector<32x128xf32>, vector<128x128xf32>, vector<32x128xf32> -> vector<32x128xf32>
    %c0_18 = arith.constant 0 : index
    %c0_19 = arith.constant 0 : index
    %21 = vector.load %arg9[%c0_18, %c0_19] : memref<1x128xf32, #tpu.memory_space<vmem>>, vector<1x128xf32>
    %22 = vector.broadcast %21 : vector<1x128xf32> to vector<32x128xf32>
    %23 = arith.addf %20, %22 : vector<32x128xf32>
    %c0_20 = arith.constant 0 : index
    %c0_21 = arith.constant 0 : index
    %24 = vector.load %arg10[%c0_20, %c0_21] : memref<32x128xf32, #tpu.memory_space<vmem>>, vector<32x128xf32>
    tpu.vector_store %arg10[%c0_20, %c0_21], %23 {strides = array<i32>} : memref<32x128xf32, #tpu.memory_space<vmem>>, vector<32x128xf32>,
    return
  }
  func.func @transform_0(%arg0: i32) -> (i32, i32) {
    %c0_i32 = arith.constant 0 : i32
    %c0_i32_0 = arith.constant 0 : i32
    return %arg0, %c0_i32 : i32, i32
  }
  func.func @transform_1(%arg0: i32) -> (i32, i32) {
    %c0_i32 = arith.constant 0 : i32
    %c0_i32_0 = arith.constant 0 : i32
    %c0_i32_1 = arith.constant 0 : i32
    return %c0_i32, %c0_i32_0 : i32, i32
  }
  func.func @transform_2(%arg0: i32) -> (i32, i32) {
    %c0_i32 = arith.constant 0 : i32
    %c0_i32_0 = arith.constant 0 : i32
    %c0_i32_1 = arith.constant 0 : i32
    return %c0_i32, %c0_i32_0 : i32, i32
  }
  func.func @transform_3(%arg0: i32) -> (i32, i32) {
    %c0_i32 = arith.constant 0 : i32
    %c0_i32_0 = arith.constant 0 : i32
    %c0_i32_1 = arith.constant 0 : i32
    return %c0_i32, %c0_i32_0 : i32, i32
  }
  func.func @transform_4(%arg0: i32) -> (i32, i32) {
    %c0_i32 = arith.constant 0 : i32
    %c0_i32_0 = arith.constant 0 : i32
    %c0_i32_1 = arith.constant 0 : i32
    return %c0_i32, %c0_i32_0 : i32, i32
  }
  func.func @transform_5(%arg0: i32) -> (i32, i32) {
    %c0_i32 = arith.constant 0 : i32
    %c0_i32_0 = arith.constant 0 : i32
    %c0_i32_1 = arith.constant 0 : i32
    return %c0_i32, %c0_i32_0 : i32, i32
  }
  func.func @transform_6(%arg0: i32) -> (i32, i32) {
    %c0_i32 = arith.constant 0 : i32
    %c0_i32_0 = arith.constant 0 : i32
    %c0_i32_1 = arith.constant 0 : i32
    return %c0_i32, %c0_i32_0 : i32, i32
  }
  func.func @transform_7(%arg0: i32) -> (i32, i32) {
    %c0_i32 = arith.constant 0 : i32
    %c0_i32_0 = arith.constant 0 : i32
    %c0_i32_1 = arith.constant 0 : i32
    return %c0_i32, %c0_i32_0 : i32, i32
  }
  func.func @transform_8(%arg0: i32) -> (i32, i32) {
    %c0_i32 = arith.constant 0 : i32
    %c0_i32_0 = arith.constant 0 : i32
    %c0_i32_1 = arith.constant 0 : i32
    return %c0_i32, %c0_i32_0 : i32, i32
  }
  func.func @transform_9(%arg0: i32) -> (i32, i32) {
    %c0_i32 = arith.constant 0 : i32
    %c0_i32_0 = arith.constant 0 : i32
    return %arg0, %c0_i32 : i32, i32
  }
}

</mosaic_0001>

<bundles_post_ra>
// kernel: tpu_custom_call.1
= control target key start
LH: loop header
LB: loop body
LE: loop exit
PB: predicated region body
PF: predicated region fallthrough
CT: control target
= control target key end

     0   :  { %14 = vsyncpa [#allocation3], 0  ;;  %s1798_s0 = inlined_call_operand.vmem [shape: f32[64,16], index: 0, kind: input, shape index: {}]   ;;  %s1799_s1 = inlined_call_operand.vmem [shape: f32[16,128], index: 1, kind: input, shape index: {}]   ;;  %s1800_s2 = inlined_call_operand.vmem [shape: f32[1,128], index: 2, kind: input, shape index: {}]   ;;  %s1801_s3 = inlined_call_operand.hbm [shape: f32[128,128], index: 3, kind: input, shape index: {}]   ;;  %s1802_s4 = inlined_call_operand.vmem [shape: f32[1,128], index: 4, kind: input, shape index: {}]   ;;  %s1803_s5 = inlined_call_operand.hbm [shape: f32[128,128], index: 5, kind: input, shape index: {}]   ;;  %s1804_s6 = inlined_call_operand.vmem [shape: f32[1,128], index: 6, kind: input, shape index: {}]   ;;  %s1805_s7 = inlined_call_operand.hbm [shape: f32[128,128], index: 7, kind: input, shape index: {}]   ;;  %s1806_s8 = inlined_call_operand.vmem [shape: f32[1,128], index: 8, kind: input, shape index: {}]   ;;  %s1807_s9 = inlined_call_operand.hbm [shape: f32[64,128], index: 9, kind: output, shape index: {}]  }
   0x1   :  { %15 = vsyncpa [#allocation6], 0 }
   0x2   :  { %16 = vsyncpa [#allocation4], 0 }
   0x3   :  { %18 = vsyncpa [#allocation4 + $0x1], 0  ;;  %s1565_s30 = smov 0   ;;  %s1567_s10 = smov 0  }
   0x4   :  { %s1569_s11 = smov 0   ;;  %s1571_s12 = smov 0  }
   0x5 LB: > { %1816 = sst [smem:[#allocation12_spill]] %s1493_s30  ;;  %s1586_s13 = sadd.s32 4294967295, %s1505_s12   ;;  %s1505_s12 = sphi %s1571_s12, %s1835_s12   ;;  %s1501_s11 = sphi %s1569_s11, %s1837_s11   ;;  %s1497_s10 = sphi %s1567_s10, %s1839_s10   ;;  %s1493_s30 = sphi %s1565_s30, %s1838_s30  }
   0x6   : > { %1817 = sst [smem:[#allocation13_spill]] %s1501_s11  ;;  %s936_s14 = sadd.s32 4294967294, %s1505_s12  }
   0x7   : > { %s1590_s15 = sadd.s32 1, %s1505_s12   ;;  %s225_s16 = sadd.s32 1, %s1501_s11 }
   0x8   : > { %1818 = sst [smem:[#allocation14_spill]] %s1590_s15  ;;  %s222_s17 = ssub.s32 %s1505_s12, %s1590_s15 }
   0x9   : > { %p235_p0 = scmp.ne.s32.totalorder %s1501_s11, %s1497_s10  ;;  %p223_p1 = scmp.eq.s32.totalorder %s222_s17, 0 }
   0xa   : > { %p236_p2 = scmp.eq.s32.totalorder %s1586_s13, 1  ;;  %p241_p3 = scmp.ne.s32.totalorder %s1497_s10, %s1493_s30 }
   0xb   : > { %p242_p4 = scmp.eq.s32.totalorder %s936_s14, 1  ;;  %p937_p7 = scmp.ge.s32.totalorder %s1505_s12, 1 }
   0xc   : > { %s1601_s18 = scalar_select %p223_p1, %s1501_s11, %s225_s16  }
   0xd   : > { %p1603_p5 = por %p236_p2, %p235_p0  ;;  %p1607_p6 = por %p242_p4, %p241_p3 }
   0xe   : > { %1819 = sst [smem:[#allocation15_spill]] %s1601_s18  ;;  %p249_p8 = scmp.lt.s32.totalorder %s1505_s12, 3 }
   0xf   : > { %s1820_s19 = scalar_select %p1603_p5, 1, 0 }
  0x10   : > { %s1821_s20 = scalar_select %p1607_p6, 1, 0 }
  0x11   : > { %p1808_p9 = scmp.eq.s32.totalorder %s1586_s13, 0  ;;  %p1614_p10 = pnand %p937_p7, %p249_p8 }
  0x12   : > { %1822 = sst [smem:[#allocation16_spill]] %s1821_s20  ;;  %s1507_s22 = smov [#allocation5]  }
  0x13   : > { %s1823_s21 = scalar_select %p1614_p10, 1, 0 }
  0x14   : > { %p1267_p11 = pneg %p1614_p10  ;;  %s283_s23 = sshll.u32 %s1507_s22, 4  ;;  %s1620_s23 = int_to_ptr.vmem [resolvable:$true] %s283_s23 }
  0x15   : > { %s1508_s25 = smov [#allocation2]   ;;  %s1509_s27 = smov [#allocation7]  }
  0x16   : > { %p1624_p12 = pnand %p1808_p9, %p1267_p11  ;;  %s267_s26 = sshll.u32 %s1508_s25, 4  ;;  %s1628_s26 = int_to_ptr.vmem [resolvable:$true] %s267_s26 }
  0x17   : > { %s1630_s28 = sshll.u32 %s1509_s27, 4  ;;  %s1351_s16 = scalar_lea.hbm %s1803_s5, 2048  ;;  %s300_s28 = int_to_ptr.vmem [resolvable:$true] %s1630_s28 }
  0x18   : > { %p1352_p13 = scmp.ne.s32.totalorder %s1803_s5, %s1351_s16  ;;  %p1640_p0 = pneg %p1624_p12 }
  0x19   : > { %p1358_p3 = scmp.lt.u32.totalorder %s1351_s16, %s1803_s5 }
  0x1a   : > { %p1354_p1 = pnand %p1640_p0, %p1352_p13 }
  0x1c   : > { %p1355_p2 = pneg %p1354_p1 }
  0x1e   : > { %p1360_p4 = pnand %p1358_p3, %p1355_p2 }
  0x20   : > { %1363 = shalt.err (!%p1360_p4)
}
  0x21   : > { %s1364_s29 = scalar_lea.vmem %s1620_s23, 2048  ;;  %p1372_p9 = scmp.lt.s32.totalorder %s1620_s23, %s1620_s23 }
  0x22   : > { %p1365_p7 = scmp.ne.s32.totalorder %s1620_s23, %s1364_s29  ;;  %p1373_p6 = scmp.lt.s32.totalorder %s1364_s29, %s1364_s29 }
  0x24   : > { %p1367_p8 = pnand %p1365_p7, %p1640_p0  ;;  %p1374_p13 = por %p1373_p6, %p1372_p9 }
  0x26   : > { %p1368_p11 = pneg %p1367_p8 }
  0x28   : > { %p1375_p1 = pnand %p1374_p13, %p1368_p11 }
  0x2a   : > { %1378 = shalt.err (!%p1375_p1)
}
  0x2b   : > { %s1510_s14 = smov 128   ;;  %s1511_s16 = smov 8  }
  0x2c   : > { %1273 = dma.hbm_to_vmem [thread:$0]  (!%p1624_p12), %s1803_s5, 2048, %s1620_s23, [#allocation6], %s1510_s14, %s1510_s14, %s1511_s16  }
  0x2d   : > { %s1379_s29 = scalar_lea.hbm %s1801_s3, 2048 }
  0x2e   : > { %p1380_p6 = scmp.ne.s32.totalorder %s1801_s3, %s1379_s29  ;;  %p1386_p3 = scmp.lt.u32.totalorder %s1379_s29, %s1801_s3 }
  0x30   : > { %p1382_p9 = pnand %p1380_p6, %p1640_p0 }
  0x32   : > { %p1383_p2 = pneg %p1382_p9 }
  0x34   : > { %p1388_p4 = pnand %p1386_p3, %p1383_p2 }
  0x36   : > { %1391 = shalt.err (!%p1388_p4)
}
  0x37   : > { %s1392_s23 = scalar_lea.vmem %s1628_s26, 2048  ;;  %p1400_p13 = scmp.lt.s32.totalorder %s1628_s26, %s1628_s26 }
  0x38   : > { %p1393_p7 = scmp.ne.s32.totalorder %s1628_s26, %s1392_s23  ;;  %p1401_p1 = scmp.lt.s32.totalorder %s1392_s23, %s1392_s23 }
  0x3a   : > { %p1395_p8 = pnand %p1393_p7, %p1640_p0  ;;  %p1402_p6 = por %p1401_p1, %p1400_p13 }
  0x3c   : > { %p1396_p11 = pneg %p1395_p8 }
  0x3e   : > { %p1403_p9 = pnand %p1402_p6, %p1396_p11 }
  0x40   : > { %1406 = shalt.err (!%p1403_p9)
}
  0x41   : > { %1270 = dma.hbm_to_vmem [thread:$0]  (!%p1624_p12), %s1801_s3, 2048, %s1628_s26, [#allocation3], %s1510_s14, %s1510_s14, %s1511_s16  }
  0x42   : > { %s1407_s17 = scalar_lea.hbm %s1805_s7, 2048 }
  0x43   : > { %p1408_p2 = scmp.ne.s32.totalorder %s1805_s7, %s1407_s17  ;;  %p1414_p7 = scmp.lt.u32.totalorder %s1407_s17, %s1805_s7 }
  0x45   : > { %p1410_p3 = pnand %p1408_p2, %p1640_p0 }
  0x47   : > { %p1411_p4 = pneg %p1410_p3 }
  0x49   : > { %p1416_p8 = pnand %p1414_p7, %p1411_p4 }
  0x4b   : > { %1419 = shalt.err (!%p1416_p8)
}
  0x4c   : > { %s1420_s23 = scalar_lea.vmem %s300_s28, 2048  ;;  %p1428_p6 = scmp.lt.s32.totalorder %s300_s28, %s300_s28 }
  0x4d   : > { %p1421_p11 = scmp.ne.s32.totalorder %s300_s28, %s1420_s23  ;;  %p1429_p9 = scmp.lt.s32.totalorder %s1420_s23, %s1420_s23 }
  0x4f   : > { %p1423_p13 = pnand %p1421_p11, %p1640_p0  ;;  %p1430_p5 = por %p1429_p9, %p1428_p6 }
  0x51   : > { %p1424_p1 = pneg %p1423_p13 }
  0x53   : > { %p1431_p10 = pnand %p1430_p5, %p1424_p1 }
  0x55   : > { %1434 = shalt.err (!%p1431_p10)
}
  0x56   : > { %1276 = dma.hbm_to_vmem [thread:$0]  (!%p1624_p12), %s1805_s7, 2048, %s300_s28, [#allocation6], %s1510_s14, %s1510_s14, %s1511_s16  }
  0x57   : > { %p1826_p2 = scmp.ne.s32.totalorder %s1823_s21, 0 }
  0x58   : > { %p1827_p0 = scmp.eq.s32.totalorder (!%p1826_p2), %s1586_s13, 0 }
  0x59   : > { %327 = sbr.rel (%p1826_p2) target bundleno = 1023 (0x3ff), region = 56 }
  0x60   : > { %1480 = dma.done.wait (%p1827_p0), [#allocation3], 2048   ;;  %p1828_p3 = pmov %p1827_p0 }
  0x61   : > { %p1829_p5 = pmov %p1827_p0 }
  0x62   : > { %1482 = vsyncadd (%p1828_p3), [#allocation3], 4294965248 }
  0x63   : > { %1484 = dma.done.wait (%p1829_p5), [#allocation6], 4096   ;;  %p1830_p10 = pmov %p1827_p0 }
  0x64   : > { %s947_s18 = sshll.u32 %s1586_s13, 2  ;;  %vm391_vm0 = vcmask 130048   ;;  %v382_v0 = vld [vmem:[%s1799_s1] sm:$0xff]  ;;  %v383_v1 = vld [vmem:[%s1799_s1 + $0x8] sm:$0xff]  ;;  %v495_v6 = vld [vmem:[#allocation2 + $0x10] sm:$0xff]  ;;  %s368_s26 = sand.u32 1, %s1497_s10  }
  0x65   : > { %1486 = vsyncadd (%p1830_p10), [#allocation6], 4294963200  ;;  %p372_p4 = scmp.lt.s32.totalorder %s947_s18, 7  ;;  %v1153_v3 = vpack.c.bf16 %v383_v1, %v382_v0  ;;  %v493_v4 = vld [vmem:[#allocation2] sm:$0xff]  ;;  %v494_v5 = vld [vmem:[#allocation2 + $0x8] sm:$0xff]  ;;  %s946_s30 = sshll.u32 %s368_s26, 5 }
  0x66   : > { %v1157_v7 = vpack.c.bf16 %v494_v5, %v493_v4  ;;  %v496_v8 = vld [vmem:[#allocation2 + $0x18] sm:$0xff]  ;;  %v497_v11 = vld [vmem:[#allocation2 + $0x20] sm:$0xff]  ;;  %v498_v12 = vld [vmem:[#allocation2 + $0x28] sm:$0xff]  ;;  %s370_s21 = scalar_lea.vmem [#allocation8], %s946_s30  ;;  %s1757_s20 = scalar_lea.sflag [#allocation4], %s368_s26 }
  0x67   : > { %s1841_s18 = smov (!%p372_p4, %s947_s18), 7  ;;  %1154 = vmatprep.subr.bf16.mxu0 %v1153_v3  ;;  %v1161_v10 = vpack.c.bf16 %v496_v8, %v495_v6  ;;  %v1165_v14 = vpack.c.bf16 %v498_v12, %v497_v11  ;;  %v499_v16 = vld [vmem:[#allocation2 + $0x30] sm:$0xff]  ;;  %v500_v17 = vld [vmem:[#allocation2 + $0x38] sm:$0xff]  ;;  %v501_v19 = vld [vmem:[#allocation2 + $0x40] sm:$0xff]  ;;  %s843_s28 = sshll.u32 %s370_s21, 4  ;;  %s1750_s28 = int_to_ptr.vmem [resolvable:$true] %s843_s28 }
  0x68   : > { %s948_s24 = sshll.u32 %s1841_s18, 3  ;;  %1156 = vmatpush3.bf16.msra.mxu0 %v1153_v3  ;;  %1158 = vmatprep.subr.bf16.mxu1 %v1157_v7  ;;  %v1169_v18 = vpack.c.bf16 %v500_v17, %v499_v16  ;;  %v502_v20 = vld [vmem:[#allocation2 + $0x48] sm:$0xff]  ;;  %v503_v22 = vld [vmem:[#allocation2 + $0x50] sm:$0xff]  ;;  %v504_v23 = vld [vmem:[#allocation2 + $0x58] sm:$0xff]  ;;  %p1831_p7 = scmp.ne.s32.totalorder %s1820_s19, 0 }
  0x69   : > { %s375_s14 = scalar_lea.vmem %s1798_s0, %s948_s24  ;;  %1160 = vmatpush3.bf16.msra.mxu1 %v1157_v7  ;;  %v1173_v21 = vpack.c.bf16 %v502_v20, %v501_v19  ;;  %v1177_v24 = vpack.c.bf16 %v504_v23, %v503_v22  ;;  %v505_v25 = vld [vmem:[#allocation2 + $0x60] sm:$0xff]  ;;  %v506_v26 = vld [vmem:[#allocation2 + $0x68] sm:$0xff]  ;;  %v507_v28 = vld [vmem:[#allocation2 + $0x70] sm:$0xff]  ;;  %s1512_s17 = smov [#allocation8]  }
  0x6a   : > { %v378_v2 = vld [vmem:[%s375_s14] sm:$0xff]  ;;  %v379_v9 = vld [vmem:[%s375_s14 + $0x8] sm:$0xff]  ;;  %v380_v13 = vld [vmem:[%s375_s14 + $0x10] sm:$0xff]  ;;  %1162 = vmatprep.subr.bf16.mxu1 %v1161_v10  ;;  %v1181_v27 = vpack.c.bf16 %v506_v26, %v505_v25  ;;  %s1439_s22 = sshll.u32 %s1512_s17, 4  ;;  %s1440_s22 = int_to_ptr.vmem [resolvable:$false] %s1439_s22 }
  0x6b   : > { %1033 = vmatprep.mubr.msk.f32.mxu0 %vm391_vm0, %v378_v2  ;;  %v381_v15 = vld [vmem:[%s375_s14 + $0x18] sm:$0xff]  ;;  %v605_v31 = vld [vmem:[#allocation5] sm:$0xff]  ;;  %v606_v32 = vld [vmem:[#allocation5 + $0x8] sm:$0xff]  ;;  %s962_s14 = sshll.u32 %s1586_s13, 9  ;;  %s1435_s13 = scalar_lea.vmem %s1750_s28, 512 }
  0x6c   : > { %1034 = vmatmul.mubr.msk.f32.vlgmr.msra.gmra.mrb[0].mxu0 %vm391_vm0, %v379_v9  ;;  %v508_v29 = vld [vmem:[#allocation2 + $0x78] sm:$0xff]  ;;  %v607_v33 = vld [vmem:[#allocation5 + $0x10] sm:$0xff]  ;;  %v1189_v34 = vpack.c.bf16 %v606_v32, %v605_v31  ;;  %v609_v37 = vld [vmem:[#allocation5 + $0x20] sm:$0xff]  ;;  %s1755_s15 = scalar_lea.hbm %s1807_s9, %s962_s14  ;;  %p1436_p12 = scmp.ne.s32.totalorder %s1750_s28, %s1435_s13 }
  0x6d   : > { %1036 = vmatprep.mubr.msk.f32.mxu0 %vm391_vm0, %v380_v13  ;;  %1164 = vmatpush3.bf16.msra.mxu1 %v1161_v10  ;;  %v1185_v30 = vpack.c.bf16 %v508_v29, %v507_v28  ;;  %v608_v35 = vld [vmem:[#allocation5 + $0x18] sm:$0xff]  ;;  %v610_v38 = vld [vmem:[#allocation5 + $0x28] sm:$0xff]  ;;  %v611_v40 = vld [vmem:[#allocation5 + $0x30] sm:$0xff]  ;;  %s1441_s25 = scalar_lea.vmem %s1440_s22, 1024  ;;  %p1442_p13 = scmp.lt.s32.totalorder %s1750_s28, %s1440_s22 }
  0x6e   : > { %1166 = vmatprep.subr.bf16.mxu1 %v1165_v14  ;;  %v1193_v36 = vpack.c.bf16 %v608_v35, %v607_v33  ;;  %1190 = vmatprep.subr.bf16.mxu0 %v1189_v34  ;;  %v1197_v39 = vpack.c.bf16 %v610_v38, %v609_v37  ;;  %v612_v41 = vld [vmem:[#allocation5 + $0x38] sm:$0xff]  ;;  %v949_v43 = vld [vmem:[%s1800_s2] ss:$0 sm:$0xff]  ;;  %v614_v57 = vld [vmem:[#allocation5 + $0x48] sm:$0xff]  ;;  %p1437_p8 = pnand %p1436_p12, %p1831_p7  ;;  %p1443_p1 = scmp.lt.s32.totalorder %s1441_s25, %s1435_s13 }
  0x6f   : > { %1192 = vmatpush3.bf16.msra.mxu0 %v1189_v34  ;;  %v1201_v42 = vpack.c.bf16 %v612_v41, %v611_v40  ;;  %v613_v56 = vld [vmem:[#allocation5 + $0x40] sm:$0xff]  ;;  %v615_v59 = vld [vmem:[#allocation5 + $0x50] sm:$0xff]  ;;  %v616_v60 = vld [vmem:[#allocation5 + $0x58] sm:$0xff] }
  0x70   : > { %1037 = vmatmul.mubr.msk.f32.gmra.mrb[2].mxu0 %vm391_vm0, %v381_v15  ;;  %1194 = vmatprep.subr.bf16.mxu0 %v1193_v36  ;;  %v1205_v58 = vpack.c.bf16 %v614_v57, %v613_v56  ;;  %v1209_v61 = vpack.c.bf16 %v616_v60, %v615_v59  ;;  %v617_v62 = vld [vmem:[#allocation5 + $0x60] sm:$0xff]  ;;  %v618_v63 = vld [vmem:[#allocation5 + $0x68] sm:$0xff]  ;;  %v619_v1 = vld [vmem:[#allocation5 + $0x70] sm:$0xff]  ;;  %p1438_p11 = pneg %p1437_p8  ;;  %p1444_p6 = por %p1443_p1, %p1442_p13 }
  0x71   : > { %1168 = vmatpush3.bf16.msra.mxu1 %v1165_v14  ;;  %v1213_v0 = vpack.c.bf16 %v618_v63, %v617_v62  ;;  %v620_v2 = vld [vmem:[#allocation5 + $0x78] sm:$0xff]  ;;  %v717_v4 = vld [vmem:[#allocation7] sm:$0xff]  ;;  %v718_v5 = vld [vmem:[#allocation7 + $0x8] sm:$0xff] }
  0x72   : > { %1170 = vmatprep.subr.bf16.mxu1 %v1169_v18  ;;  %v1217_v3 = vpack.c.bf16 %v620_v2, %v619_v1  ;;  %v719_v6 = vld [vmem:[#allocation7 + $0x10] sm:$0xff]  ;;  %v1221_v7 = vpack.c.bf16 %v718_v5, %v717_v4  ;;  %v720_v8 = vld [vmem:[#allocation7 + $0x18] sm:$0xff]  ;;  %v721_v10 = vld [vmem:[#allocation7 + $0x20] sm:$0xff]  ;;  %p1445_p9 = pnand %p1444_p6, %p1438_p11 }
  0x73   : > { %1196 = vmatpush3.bf16.msra.mxu0 %v1193_v36  ;;  %v1225_v9 = vpack.c.bf16 %v720_v8, %v719_v6  ;;  %v722_v11 = vld [vmem:[#allocation7 + $0x28] sm:$0xff]  ;;  %v723_v13 = vld [vmem:[#allocation7 + $0x30] sm:$0xff]  ;;  %v724_v14 = vld [vmem:[#allocation7 + $0x38] sm:$0xff] }
  0x74   : > { %1198 = vmatprep.subr.bf16.mxu0 %v1197_v39  ;;  %v1229_v12 = vpack.c.bf16 %v722_v11, %v721_v10  ;;  %v1233_v15 = vpack.c.bf16 %v724_v14, %v723_v13  ;;  %v954_v16 = vld [vmem:[%s1802_s4] ss:$0 sm:$0xff]  ;;  %v727_v32 = vld [vmem:[#allocation7 + $0x50] sm:$0xff]  ;;  %v728_v33 = vld [vmem:[#allocation7 + $0x58] sm:$0xff] }
  0x75   : > { %1172 = vmatpush3.bf16.msra.mxu1 %v1169_v18  ;;  %v725_v29 = vld [vmem:[#allocation7 + $0x40] sm:$0xff]  ;;  %v1241_v34 = vpack.c.bf16 %v728_v33, %v727_v32  ;;  %v730_v36 = vld [vmem:[#allocation7 + $0x68] sm:$0xff]  ;;  %v731_v38 = vld [vmem:[#allocation7 + $0x70] sm:$0xff] }
  0x76   : > { %1174 = vmatprep.subr.bf16.mxu1 %v1173_v21  ;;  %v729_v35 = vld [vmem:[#allocation7 + $0x60] sm:$0xff] }
  0x77   : > { %1200 = vmatpush3.bf16.msra.mxu0 %v1197_v39  ;;  %v1245_v37 = vpack.c.bf16 %v730_v36, %v729_v35  ;;  %v732_v39 = vld [vmem:[#allocation7 + $0x78] sm:$0xff]  ;;  %v955_v41 = vld [vmem:[%s1804_s6] ss:$0 sm:$0xff] }
  0x78   : > { %1202 = vmatprep.subr.bf16.mxu0 %v1201_v42  ;;  %v1249_v40 = vpack.c.bf16 %v732_v39, %v731_v38 }
  0x79   : > { %1176 = vmatpush3.bf16.msra.mxu1 %v1173_v21 }
  0x7a   : > { %1178 = vmatprep.subr.bf16.mxu1 %v1177_v24 }
  0x7b   : > { %1204 = vmatpush3.bf16.msra.mxu0 %v1201_v42 }
  0x7c   : > { %1206 = vmatprep.subr.bf16.mxu0 %v1205_v58 }
  0x7d   : > { %1180 = vmatpush3.bf16.msra.mxu1 %v1177_v24 }
  0x7e   : > { %1182 = vmatprep.subr.bf16.mxu1 %v1181_v27 }
  0x7f   : > { %1208 = vmatpush3.bf16.msra.mxu0 %v1205_v58 }
  0x80   : > { %1210 = vmatprep.subr.bf16.mxu0 %v1209_v61 }
  0x81   : > { %1184 = vmatpush3.bf16.msra.mxu1 %v1181_v27 }
  0x82   : > { %1186 = vmatprep.subr.bf16.mxu1 %v1185_v30 }
  0x83   : > { %1212 = vmatpush3.bf16.msra.mxu0 %v1209_v61 }
  0x84   : > { %1214 = vmatprep.subr.bf16.mxu0 %v1213_v0 }
  0x85   : > { %1188 = vmatpush3.bf16.msra.mxu1 %v1185_v30  ;;  %v726_v30 = vld [vmem:[#allocation7 + $0x48] sm:$0xff] }
  0x86   : > { %1222 = vmatprep.subr.bf16.mxu1 %v1221_v7  ;;  %v1237_v31 = vpack.c.bf16 %v726_v30, %v725_v29 }
  0x87   : > { %1216 = vmatpush3.bf16.msra.mxu0 %v1213_v0 }
  0x88   : > { %1218 = vmatprep.subr.bf16.mxu0 %v1217_v3 }
  0x8b   : > { %1220 = vmatpush3.bf16.msra.mxu0 %v1217_v3 }
 0x13f   : > { %v1035_v44 = vpop.f32.mrb[0].mxu0 }
 0x140   : > { %v476_v45 = vadd.f32 %v1035_v44, %v949_v43  ;;  %v470_v46 = vpop.f32.mrb[1].mxu0 }
 0x141   : > { %v471_v47 = vadd.f32 %v949_v43, %v470_v46 }
 0x143   : > { %1327 = vtanh.f32 %v471_v47  ;;  %v1038_v48 = vpop.f32.mrb[2].mxu0 }
 0x144   : > { %1329 = vtanh.f32 %v476_v45  ;;  %v486_v49 = vadd.f32 %v1038_v48, %v949_v43  ;;  %v480_v50 = vpop.f32.mrb[3].mxu0 }
 0x145   : > { %v481_v51 = vadd.f32 %v949_v43, %v480_v50 }
 0x147   : > { %1331 = vtanh.f32 %v481_v51 }
 0x148   : > { %1333 = vtanh.f32 %v486_v49 }
 0x14d   : > { %v1328_v52 = vpop.eup %1327 }
 0x14e   : > { %v1330_v53 = vpop.eup %1329  ;;  %1071 = vmatprep.mubr.f32.mxu1 %v1328_v52 }
 0x14f   : > { %1072 = vmatmul.mubr.f32.vlgmr.msra.gmra.mrb[0].mxu1 %v1330_v53 }
 0x150   : > { %1224 = vmatpush3.bf16.msra.mxu1 %v1221_v7 }
 0x151   : > { %v1332_v54 = vpop.eup %1331  ;;  %1226 = vmatprep.subr.bf16.mxu1 %v1225_v9 }
 0x152   : > { %v1334_v55 = vpop.eup %1333  ;;  %1074 = vmatprep.mubr.f32.mxu1 %v1332_v54  ;;  %v956_v54 = vld [vmem:[%s1806_s8] ss:$0 sm:$0xff] }
 0x153   : > { %1075 = vmatmul.mubr.f32.gmra.mrb[2].mxu1 %v1334_v55 }
 0x154   : > { %1228 = vmatpush3.bf16.msra.mxu1 %v1225_v9 }
 0x155   : > { %1230 = vmatprep.subr.bf16.mxu1 %v1229_v12 }
 0x158   : > { %1232 = vmatpush3.bf16.msra.mxu1 %v1229_v12 }
 0x159   : > { %1234 = vmatprep.subr.bf16.mxu1 %v1233_v15 }
 0x15c   : > { %1236 = vmatpush3.bf16.msra.mxu1 %v1233_v15 }
 0x15d   : > { %1238 = vmatprep.subr.bf16.mxu1 %v1237_v31 }
 0x160   : > { %1240 = vmatpush3.bf16.msra.mxu1 %v1237_v31 }
 0x161   : > { %1242 = vmatprep.subr.bf16.mxu1 %v1241_v34 }
 0x164   : > { %1244 = vmatpush3.bf16.msra.mxu1 %v1241_v34 }
 0x165   : > { %1246 = vmatprep.subr.bf16.mxu1 %v1245_v37 }
 0x168   : > { %1248 = vmatpush3.bf16.msra.mxu1 %v1245_v37 }
 0x169   : > { %1250 = vmatprep.subr.bf16.mxu1 %v1249_v40 }
 0x16c   : > { %1252 = vmatpush3.bf16.msra.mxu1 %v1249_v40 }
 0x222   : > { %v1073_v17 = vpop.f32.mrb[0].mxu1 }
 0x223   : > { %v588_v18 = vadd.f32 %v1073_v17, %v954_v16  ;;  %v582_v19 = vpop.f32.mrb[1].mxu1 }
 0x224   : > { %v583_v20 = vadd.f32 %v954_v16, %v582_v19 }
 0x226   : > { %1335 = vtanh.f32 %v583_v20  ;;  %v1076_v21 = vpop.f32.mrb[2].mxu1 }
 0x227   : > { %1337 = vtanh.f32 %v588_v18  ;;  %v598_v22 = vadd.f32 %v1076_v21, %v954_v16  ;;  %v592_v23 = vpop.f32.mrb[3].mxu1 }
 0x228   : > { %v593_v24 = vadd.f32 %v954_v16, %v592_v23 }
 0x22a   : > { %1339 = vtanh.f32 %v593_v24 }
 0x22b   : > { %1341 = vtanh.f32 %v598_v22 }
 0x230   : > { %v1336_v25 = vpop.eup %1335 }
 0x231   : > { %v1338_v26 = vpop.eup %1337  ;;  %1109 = vmatprep.mubr.f32.mxu0 %v1336_v25 }
 0x232   : > { %1110 = vmatmul.mubr.f32.vlgmr.msra.gmra.mrb[4].mxu0 %v1338_v26 }
 0x234   : > { %v1340_v27 = vpop.eup %1339 }
 0x235   : > { %v1342_v28 = vpop.eup %1341  ;;  %1112 = vmatprep.mubr.f32.mxu0 %v1340_v27 }
 0x236   : > { %1113 = vmatmul.mubr.f32.gmra.mrb[6].mxu0 %v1342_v28 }
 0x305   : > { %v1111_v42 = vpop.f32.mrb[4].mxu0 }
 0x306   : > { %v700_v43 = vadd.f32 %v1111_v42, %v955_v41  ;;  %v694_v44 = vpop.f32.mrb[5].mxu0 }
 0x307   : > { %v695_v45 = vadd.f32 %v955_v41, %v694_v44 }
 0x309   : > { %1343 = vtanh.f32 %v695_v45  ;;  %v1114_v46 = vpop.f32.mrb[6].mxu0 }
 0x30a   : > { %1345 = vtanh.f32 %v700_v43  ;;  %v710_v47 = vadd.f32 %v1114_v46, %v955_v41  ;;  %v704_v48 = vpop.f32.mrb[7].mxu0 }
 0x30b   : > { %v705_v49 = vadd.f32 %v955_v41, %v704_v48 }
 0x30d   : > { %1347 = vtanh.f32 %v705_v49 }
 0x30e   : > { %1349 = vtanh.f32 %v710_v47 }
 0x313   : > { %v1344_v50 = vpop.eup %1343 }
 0x314   : > { %v1346_v51 = vpop.eup %1345  ;;  %1147 = vmatprep.mubr.f32.mxu1 %v1344_v50 }
 0x315   : > { %1148 = vmatmul.mubr.f32.vlgmr.msra.gmra.mrb[4].mxu1 %v1346_v51 }
 0x317   : > { %v1348_v52 = vpop.eup %1347 }
 0x318   : > { %v1350_v53 = vpop.eup %1349  ;;  %1150 = vmatprep.mubr.f32.mxu1 %v1348_v52 }
 0x319   : > { %1151 = vmatmul.mubr.f32.gmra.mrb[6].mxu1 %v1350_v53 }
 0x3e8   : > { %v1149_v55 = vpop.f32.mrb[4].mxu1 }
 0x3e9   : > { %v812_v56 = vadd.f32 %v1149_v55, %v956_v54  ;;  %v806_v57 = vpop.f32.mrb[5].mxu1 }
 0x3ea   : > { %v807_v58 = vadd.f32 %v956_v54, %v806_v57 }
 0x3eb   : > { %826 = vst [vmem:[%s370_s21 + $0x8] sm:$0xff] %v812_v56 }
 0x3ec   : > { %825 = vst [vmem:[%s370_s21] sm:$0xff] %v807_v58  ;;  %v1152_v59 = vpop.f32.mrb[6].mxu1 }
 0x3ed   : > { %v822_v60 = vadd.f32 %v1152_v59, %v956_v54  ;;  %v816_v61 = vpop.f32.mrb[7].mxu1 }
 0x3ee   : > { %v817_v62 = vadd.f32 %v956_v54, %v816_v61 }
 0x3ef   : > { %828 = vst [vmem:[%s370_s21 + $0x18] sm:$0xff] %v822_v60 }
 0x3f0   : > { %827 = vst [vmem:[%s370_s21 + $0x10] sm:$0xff] %v817_v62 }
 0x3f1   : > { %1448 = shalt.err (!%p1445_p9)
}
 0x3f2   : > { %s1449_s27 = scalar_lea.hbm %s1755_s15, 512  ;;  %s1453_s26 = scalar_lea.hbm %s1807_s9, 1024 }
 0x3f3   : > { %p1450_p2 = scmp.ne.s32.totalorder %s1755_s15, %s1449_s27  ;;  %p1454_p5 = scmp.lt.u32.totalorder %s1755_s15, %s1807_s9 }
 0x3f4   : > { %p1455_p10 = scmp.lt.u32.totalorder %s1453_s26, %s1449_s27  ;;  %p1457_p12 = scmp.lt.u32.totalorder %s1449_s27, %s1755_s15 }
 0x3f5   : > { %p1451_p0 = pnand %p1450_p2, %p1831_p7 }
 0x3f6   : > { %p1456_p4 = por %p1455_p10, %p1454_p5 }
 0x3f7   : > { %p1452_p3 = pneg %p1451_p0 }
 0x3f8   : > { %p1458_p8 = por %p1457_p12, %p1456_p4 }
 0x3fa   : > { %p1459_p11 = pnand %p1458_p8, %p1452_p3 }
 0x3fc   : > { %1462 = shalt.err (!%p1459_p11)
}
 0x3fd   : > { %s1513_s24 = smov 128   ;;  %s1514_s21 = smov 8  }
 0x3fe   : > { %1265 = dma.vmem_to_hbm [thread:$0]  (%p1831_p7), %s1750_s28, 512, %s1755_s15, %s1757_s20, %s1513_s24, %s1513_s24, %s1514_s21  }
 0x3ff PF: > { %s1832_s14 = sld [smem:[#allocation12_spill]]  ;;  %s1833_s16 = sld [smem:[#allocation16_spill]] }
 0x400   : > { %p1287_p13 = scmp.ge.s32.totalorder %s1505_s12, 2 }
 0x405   : > { %s858_s11 = sand.u32 1, %s1832_s14   ;;  %p1834_p1 = scmp.ne.s32.totalorder %s1833_s16, 0 }
 0x406   : > { %s859_s13 = scalar_lea.sflag [#allocation4], %s858_s11 }
 0x407   : > { %p1278_p6 = pnand %p1287_p13, %p1834_p1 }
 0x409   : > { %1488 = dma.done.wait (!%p1278_p6), %s859_s13, 512  }
 0x40a   : > { %1490 = vsyncadd (!%p1278_p6), %s859_s13, 4294966784  ;;  %s1835_s12 = sld [smem:[#allocation14_spill]]  ;;  %s1836_s17 = sld [smem:[#allocation13_spill]] }
 0x40b   : > { %s1837_s11 = sld [smem:[#allocation15_spill]]  ;;  %s1838_s30 = smov %s1497_s10 }
 0x410   : > { %p21_p9 = scmp.ge.s32.totalorder %s1835_s12, 4   ;;  %s1839_s10 = smov %s1836_s17 }
 0x412   :  { %23 = sbr.rel (!%p21_p9) target bundleno = 5 (0x5), region = 104 }
 0x419   :  { %864 = vsyncpa [#allocation3], 1 }
 0x41a   :  { %866 = vsyncpa [#allocation3 + $0x1], 1 }
 0x41b   :  { %867 = vsyncpa [#allocation6], 1 }
 0x41c   :  { %868 = vsyncpa [#allocation4], 1 }
 0x41d   :  { %870 = vsyncpa [#allocation4 + $0x1], 1 }

// kernel: tpu_custom_call.1
= control target key start
LH: loop header
LB: loop body
LE: loop exit
PB: predicated region body
PF: predicated region fallthrough
CT: control target
= control target key end

     0   :  { %14 = vsyncpa [#allocation3], 0  ;;  %s1798_s0 = inlined_call_operand.vmem [shape: f32[64,16], index: 0, kind: input, shape index: {}]   ;;  %s1799_s1 = inlined_call_operand.vmem [shape: f32[16,128], index: 1, kind: input, shape index: {}]   ;;  %s1800_s2 = inlined_call_operand.vmem [shape: f32[1,128], index: 2, kind: input, shape index: {}]   ;;  %s1801_s3 = inlined_call_operand.hbm [shape: f32[128,128], index: 3, kind: input, shape index: {}]   ;;  %s1802_s4 = inlined_call_operand.vmem [shape: f32[1,128], index: 4, kind: input, shape index: {}]   ;;  %s1803_s5 = inlined_call_operand.hbm [shape: f32[128,128], index: 5, kind: input, shape index: {}]   ;;  %s1804_s6 = inlined_call_operand.vmem [shape: f32[1,128], index: 6, kind: input, shape index: {}]   ;;  %s1805_s7 = inlined_call_operand.hbm [shape: f32[128,128], index: 7, kind: input, shape index: {}]   ;;  %s1806_s8 = inlined_call_operand.vmem [shape: f32[1,128], index: 8, kind: input, shape index: {}]   ;;  %s1807_s9 = inlined_call_operand.hbm [shape: f32[64,128], index: 9, kind: output, shape index: {}]  }
   0x1   :  { %15 = vsyncpa [#allocation6], 0 }
   0x2   :  { %16 = vsyncpa [#allocation4], 0 }
   0x3   :  { %18 = vsyncpa [#allocation4 + $0x1], 0  ;;  %s1565_s30 = smov 0   ;;  %s1567_s10 = smov 0  }
   0x4   :  { %s1569_s11 = smov 0   ;;  %s1571_s12 = smov 0  }
   0x5 LB: > { %1816 = sst [smem:[#allocation12_spill]] %s1493_s30  ;;  %s1586_s13 = sadd.s32 4294967295, %s1505_s12   ;;  %s1505_s12 = sphi %s1571_s12, %s1835_s12   ;;  %s1501_s11 = sphi %s1569_s11, %s1837_s11   ;;  %s1497_s10 = sphi %s1567_s10, %s1839_s10   ;;  %s1493_s30 = sphi %s1565_s30, %s1838_s30  }
   0x6   : > { %1817 = sst [smem:[#allocation13_spill]] %s1501_s11  ;;  %s936_s14 = sadd.s32 4294967294, %s1505_s12  }
   0x7   : > { %s1590_s15 = sadd.s32 1, %s1505_s12   ;;  %s225_s16 = sadd.s32 1, %s1501_s11 }
   0x8   : > { %1818 = sst [smem:[#allocation14_spill]] %s1590_s15  ;;  %s222_s17 = ssub.s32 %s1505_s12, %s1590_s15 }
   0x9   : > { %p235_p0 = scmp.ne.s32.totalorder %s1501_s11, %s1497_s10  ;;  %p223_p1 = scmp.eq.s32.totalorder %s222_s17, 0 }
   0xa   : > { %p236_p2 = scmp.eq.s32.totalorder %s1586_s13, 1  ;;  %p241_p3 = scmp.ne.s32.totalorder %s1497_s10, %s1493_s30 }
   0xb   : > { %p242_p4 = scmp.eq.s32.totalorder %s936_s14, 1  ;;  %p937_p7 = scmp.ge.s32.totalorder %s1505_s12, 1 }
   0xc   : > { %s1601_s18 = scalar_select %p223_p1, %s1501_s11, %s225_s16  }
   0xd   : > { %p1603_p5 = por %p236_p2, %p235_p0  ;;  %p1607_p6 = por %p242_p4, %p241_p3 }
   0xe   : > { %1819 = sst [smem:[#allocation15_spill]] %s1601_s18  ;;  %p249_p8 = scmp.lt.s32.totalorder %s1505_s12, 3 }
   0xf   : > { %s1820_s19 = scalar_select %p1603_p5, 1, 0 }
  0x10   : > { %s1821_s20 = scalar_select %p1607_p6, 1, 0 }
  0x11   : > { %p1808_p9 = scmp.eq.s32.totalorder %s1586_s13, 0  ;;  %p1614_p10 = pnand %p937_p7, %p249_p8 }
  0x12   : > { %1822 = sst [smem:[#allocation16_spill]] %s1821_s20  ;;  %s1507_s22 = smov [#allocation5]  }
  0x13   : > { %s1823_s21 = scalar_select %p1614_p10, 1, 0 }
  0x14   : > { %p1267_p11 = pneg %p1614_p10  ;;  %s283_s23 = sshll.u32 %s1507_s22, 4  ;;  %s1620_s23 = int_to_ptr.vmem [resolvable:$true] %s283_s23 }
  0x15   : > { %s1508_s25 = smov [#allocation2]   ;;  %s1509_s27 = smov [#allocation7]  }
  0x16   : > { %p1624_p12 = pnand %p1808_p9, %p1267_p11  ;;  %s267_s26 = sshll.u32 %s1508_s25, 4  ;;  %s1628_s26 = int_to_ptr.vmem [resolvable:$true] %s267_s26 }
  0x17   : > { %s1630_s28 = sshll.u32 %s1509_s27, 4  ;;  %s1351_s16 = scalar_lea.hbm %s1803_s5, 2048  ;;  %s300_s28 = int_to_ptr.vmem [resolvable:$true] %s1630_s28 }
  0x18   : > { %p1352_p13 = scmp.ne.s32.totalorder %s1803_s5, %s1351_s16  ;;  %p1640_p0 = pneg %p1624_p12 }
  0x19   : > { %p1358_p3 = scmp.lt.u32.totalorder %s1351_s16, %s1803_s5 }
  0x1a   : > { %p1354_p1 = pnand %p1640_p0, %p1352_p13 }
  0x1c   : > { %p1355_p2 = pneg %p1354_p1 }
  0x1e   : > { %p1360_p4 = pnand %p1358_p3, %p1355_p2 }
  0x20   : > { %1363 = shalt.err (!%p1360_p4)
}
  0x21   : > { %s1364_s29 = scalar_lea.vmem %s1620_s23, 2048  ;;  %p1372_p9 = scmp.lt.s32.totalorder %s1620_s23, %s1620_s23 }
  0x22   : > { %p1365_p7 = scmp.ne.s32.totalorder %s1620_s23, %s1364_s29  ;;  %p1373_p6 = scmp.lt.s32.totalorder %s1364_s29, %s1364_s29 }
  0x24   : > { %p1367_p8 = pnand %p1365_p7, %p1640_p0  ;;  %p1374_p13 = por %p1373_p6, %p1372_p9 }
  0x26   : > { %p1368_p11 = pneg %p1367_p8 }
  0x28   : > { %p1375_p1 = pnand %p1374_p13, %p1368_p11 }
  0x2a   : > { %1378 = shalt.err (!%p1375_p1)
}
  0x2b   : > { %s1510_s14 = smov 128   ;;  %s1511_s16 = smov 8  }
  0x2c   : > { %1273 = dma.hbm_to_vmem [thread:$0]  (!%p1624_p12), %s1803_s5, 2048, %s1620_s23, [#allocation6], %s1510_s14, %s1510_s14, %s1511_s16  }
  0x2d   : > { %s1379_s29 = scalar_lea.hbm %s1801_s3, 2048 }
  0x2e   : > { %p1380_p6 = scmp.ne.s32.totalorder %s1801_s3, %s1379_s29  ;;  %p1386_p3 = scmp.lt.u32.totalorder %s1379_s29, %s1801_s3 }
  0x30   : > { %p1382_p9 = pnand %p1380_p6, %p1640_p0 }
  0x32   : > { %p1383_p2 = pneg %p1382_p9 }
  0x34   : > { %p1388_p4 = pnand %p1386_p3, %p1383_p2 }
  0x36   : > { %1391 = shalt.err (!%p1388_p4)
}
  0x37   : > { %s1392_s23 = scalar_lea.vmem %s1628_s26, 2048  ;;  %p1400_p13 = scmp.lt.s32.totalorder %s1628_s26, %s1628_s26 }
  0x38   : > { %p1393_p7 = scmp.ne.s32.totalorder %s1628_s26, %s1392_s23  ;;  %p1401_p1 = scmp.lt.s32.totalorder %s1392_s23, %s1392_s23 }
  0x3a   : > { %p1395_p8 = pnand %p1393_p7, %p1640_p0  ;;  %p1402_p6 = por %p1401_p1, %p1400_p13 }
  0x3c   : > { %p1396_p11 = pneg %p1395_p8 }
  0x3e   : > { %p1403_p9 = pnand %p1402_p6, %p1396_p11 }
  0x40   : > { %1406 = shalt.err (!%p1403_p9)
}
  0x41   : > { %1270 = dma.hbm_to_vmem [thread:$0]  (!%p1624_p12), %s1801_s3, 2048, %s1628_s26, [#allocation3], %s1510_s14, %s1510_s14, %s1511_s16  }
  0x42   : > { %s1407_s17 = scalar_lea.hbm %s1805_s7, 2048 }
  0x43   : > { %p1408_p2 = scmp.ne.s32.totalorder %s1805_s7, %s1407_s17  ;;  %p1414_p7 = scmp.lt.u32.totalorder %s1407_s17, %s1805_s7 }
  0x45   : > { %p1410_p3 = pnand %p1408_p2, %p1640_p0 }
  0x47   : > { %p1411_p4 = pneg %p1410_p3 }
  0x49   : > { %p1416_p8 = pnand %p1414_p7, %p1411_p4 }
  0x4b   : > { %1419 = shalt.err (!%p1416_p8)
}
  0x4c   : > { %s1420_s23 = scalar_lea.vmem %s300_s28, 2048  ;;  %p1428_p6 = scmp.lt.s32.totalorder %s300_s28, %s300_s28 }
  0x4d   : > { %p1421_p11 = scmp.ne.s32.totalorder %s300_s28, %s1420_s23  ;;  %p1429_p9 = scmp.lt.s32.totalorder %s1420_s23, %s1420_s23 }
  0x4f   : > { %p1423_p13 = pnand %p1421_p11, %p1640_p0  ;;  %p1430_p5 = por %p1429_p9, %p1428_p6 }
  0x51   : > { %p1424_p1 = pneg %p1423_p13 }
  0x53   : > { %p1431_p10 = pnand %p1430_p5, %p1424_p1 }
  0x55   : > { %1434 = shalt.err (!%p1431_p10)
}
  0x56   : > { %1276 = dma.hbm_to_vmem [thread:$0]  (!%p1624_p12), %s1805_s7, 2048, %s300_s28, [#allocation6], %s1510_s14, %s1510_s14, %s1511_s16  }
  0x57   : > { %p1826_p2 = scmp.ne.s32.totalorder %s1823_s21, 0 }
  0x58   : > { %p1827_p0 = scmp.eq.s32.totalorder (!%p1826_p2), %s1586_s13, 0 }
  0x59   : > { %327 = sbr.rel (%p1826_p2) target bundleno = 1023 (0x3ff), region = 56 }
  0x60   : > { %1480 = dma.done.wait (%p1827_p0), [#allocation3], 2048   ;;  %p1828_p3 = pmov %p1827_p0 }
  0x61   : > { %p1829_p5 = pmov %p1827_p0 }
  0x62   : > { %1482 = vsyncadd (%p1828_p3), [#allocation3], 4294965248 }
  0x63   : > { %1484 = dma.done.wait (%p1829_p5), [#allocation6], 4096   ;;  %p1830_p10 = pmov %p1827_p0 }
  0x64   : > { %s947_s18 = sshll.u32 %s1586_s13, 2  ;;  %vm391_vm0 = vcmask 130048   ;;  %v382_v0 = vld [vmem:[%s1799_s1] sm:$0xff]  ;;  %v383_v1 = vld [vmem:[%s1799_s1 + $0x8] sm:$0xff]  ;;  %v495_v6 = vld [vmem:[#allocation2 + $0x10] sm:$0xff]  ;;  %s368_s26 = sand.u32 1, %s1497_s10  }
  0x65   : > { %1486 = vsyncadd (%p1830_p10), [#allocation6], 4294963200  ;;  %p372_p4 = scmp.lt.s32.totalorder %s947_s18, 7  ;;  %v1153_v3 = vpack.c.bf16 %v383_v1, %v382_v0  ;;  %v493_v4 = vld [vmem:[#allocation2] sm:$0xff]  ;;  %v494_v5 = vld [vmem:[#allocation2 + $0x8] sm:$0xff]  ;;  %s946_s30 = sshll.u32 %s368_s26, 5 }
  0x66   : > { %v1157_v7 = vpack.c.bf16 %v494_v5, %v493_v4  ;;  %v496_v8 = vld [vmem:[#allocation2 + $0x18] sm:$0xff]  ;;  %v497_v11 = vld [vmem:[#allocation2 + $0x20] sm:$0xff]  ;;  %v498_v12 = vld [vmem:[#allocation2 + $0x28] sm:$0xff]  ;;  %s370_s21 = scalar_lea.vmem [#allocation8], %s946_s30  ;;  %s1757_s20 = scalar_lea.sflag [#allocation4], %s368_s26 }
  0x67   : > { %s1841_s18 = smov (!%p372_p4, %s947_s18), 7  ;;  %1154 = vmatprep.subr.bf16.mxu0 %v1153_v3  ;;  %v1161_v10 = vpack.c.bf16 %v496_v8, %v495_v6  ;;  %v1165_v14 = vpack.c.bf16 %v498_v12, %v497_v11  ;;  %v499_v16 = vld [vmem:[#allocation2 + $0x30] sm:$0xff]  ;;  %v500_v17 = vld [vmem:[#allocation2 + $0x38] sm:$0xff]  ;;  %v501_v19 = vld [vmem:[#allocation2 + $0x40] sm:$0xff]  ;;  %s843_s28 = sshll.u32 %s370_s21, 4  ;;  %s1750_s28 = int_to_ptr.vmem [resolvable:$true] %s843_s28 }
  0x68   : > { %s948_s24 = sshll.u32 %s1841_s18, 3  ;;  %1156 = vmatpush3.bf16.msra.mxu0 %v1153_v3  ;;  %1158 = vmatprep.subr.bf16.mxu1 %v1157_v7  ;;  %v1169_v18 = vpack.c.bf16 %v500_v17, %v499_v16  ;;  %v502_v20 = vld [vmem:[#allocation2 + $0x48] sm:$0xff]  ;;  %v503_v22 = vld [vmem:[#allocation2 + $0x50] sm:$0xff]  ;;  %v504_v23 = vld [vmem:[#allocation2 + $0x58] sm:$0xff]  ;;  %p1831_p7 = scmp.ne.s32.totalorder %s1820_s19, 0 }
  0x69   : > { %s375_s14 = scalar_lea.vmem %s1798_s0, %s948_s24  ;;  %1160 = vmatpush3.bf16.msra.mxu1 %v1157_v7  ;;  %v1173_v21 = vpack.c.bf16 %v502_v20, %v501_v19  ;;  %v1177_v24 = vpack.c.bf16 %v504_v23, %v503_v22  ;;  %v505_v25 = vld [vmem:[#allocation2 + $0x60] sm:$0xff]  ;;  %v506_v26 = vld [vmem:[#allocation2 + $0x68] sm:$0xff]  ;;  %v507_v28 = vld [vmem:[#allocation2 + $0x70] sm:$0xff]  ;;  %s1512_s17 = smov [#allocation8]  }
  0x6a   : > { %v378_v2 = vld [vmem:[%s375_s14] sm:$0xff]  ;;  %v379_v9 = vld [vmem:[%s375_s14 + $0x8] sm:$0xff]  ;;  %v380_v13 = vld [vmem:[%s375_s14 + $0x10] sm:$0xff]  ;;  %1162 = vmatprep.subr.bf16.mxu1 %v1161_v10  ;;  %v1181_v27 = vpack.c.bf16 %v506_v26, %v505_v25  ;;  %s1439_s22 = sshll.u32 %s1512_s17, 4  ;;  %s1440_s22 = int_to_ptr.vmem [resolvable:$false] %s1439_s22 }
  0x6b   : > { %1033 = vmatprep.mubr.msk.f32.mxu0 %vm391_vm0, %v378_v2  ;;  %v381_v15 = vld [vmem:[%s375_s14 + $0x18] sm:$0xff]  ;;  %v605_v31 = vld [vmem:[#allocation5] sm:$0xff]  ;;  %v606_v32 = vld [vmem:[#allocation5 + $0x8] sm:$0xff]  ;;  %s962_s14 = sshll.u32 %s1586_s13, 9  ;;  %s1435_s13 = scalar_lea.vmem %s1750_s28, 512 }
  0x6c   : > { %1034 = vmatmul.mubr.msk.f32.vlgmr.msra.gmra.mrb[0].mxu0 %vm391_vm0, %v379_v9  ;;  %v508_v29 = vld [vmem:[#allocation2 + $0x78] sm:$0xff]  ;;  %v607_v33 = vld [vmem:[#allocation5 + $0x10] sm:$0xff]  ;;  %v1189_v34 = vpack.c.bf16 %v606_v32, %v605_v31  ;;  %v609_v37 = vld [vmem:[#allocation5 + $0x20] sm:$0xff]  ;;  %s1755_s15 = scalar_lea.hbm %s1807_s9, %s962_s14  ;;  %p1436_p12 = scmp.ne.s32.totalorder %s1750_s28, %s1435_s13 }
  0x6d   : > { %1036 = vmatprep.mubr.msk.f32.mxu0 %vm391_vm0, %v380_v13  ;;  %1164 = vmatpush3.bf16.msra.mxu1 %v1161_v10  ;;  %v1185_v30 = vpack.c.bf16 %v508_v29, %v507_v28  ;;  %v608_v35 = vld [vmem:[#allocation5 + $0x18] sm:$0xff]  ;;  %v610_v38 = vld [vmem:[#allocation5 + $0x28] sm:$0xff]  ;;  %v611_v40 = vld [vmem:[#allocation5 + $0x30] sm:$0xff]  ;;  %s1441_s25 = scalar_lea.vmem %s1440_s22, 1024  ;;  %p1442_p13 = scmp.lt.s32.totalorder %s1750_s28, %s1440_s22 }
  0x6e   : > { %1166 = vmatprep.subr.bf16.mxu1 %v1165_v14  ;;  %v1193_v36 = vpack.c.bf16 %v608_v35, %v607_v33  ;;  %1190 = vmatprep.subr.bf16.mxu0 %v1189_v34  ;;  %v1197_v39 = vpack.c.bf16 %v610_v38, %v609_v37  ;;  %v612_v41 = vld [vmem:[#allocation5 + $0x38] sm:$0xff]  ;;  %v949_v43 = vld [vmem:[%s1800_s2] ss:$0 sm:$0xff]  ;;  %v614_v57 = vld [vmem:[#allocation5 + $0x48] sm:$0xff]  ;;  %p1437_p8 = pnand %p1436_p12, %p1831_p7  ;;  %p1443_p1 = scmp.lt.s32.totalorder %s1441_s25, %s1435_s13 }
  0x6f   : > { %1192 = vmatpush3.bf16.msra.mxu0 %v1189_v34  ;;  %v1201_v42 = vpack.c.bf16 %v612_v41, %v611_v40  ;;  %v613_v56 = vld [vmem:[#allocation5 + $0x40] sm:$0xff]  ;;  %v615_v59 = vld [vmem:[#allocation5 + $0x50] sm:$0xff]  ;;  %v616_v60 = vld [vmem:[#allocation5 + $0x58] sm:$0xff] }
  0x70   : > { %1037 = vmatmul.mubr.msk.f32.gmra.mrb[2].mxu0 %vm391_vm0, %v381_v15  ;;  %1194 = vmatprep.subr.bf16.mxu0 %v1193_v36  ;;  %v1205_v58 = vpack.c.bf16 %v614_v57, %v613_v56  ;;  %v1209_v61 = vpack.c.bf16 %v616_v60, %v615_v59  ;;  %v617_v62 = vld [vmem:[#allocation5 + $0x60] sm:$0xff]  ;;  %v618_v63 = vld [vmem:[#allocation5 + $0x68] sm:$0xff]  ;;  %v619_v1 = vld [vmem:[#allocation5 + $0x70] sm:$0xff]  ;;  %p1438_p11 = pneg %p1437_p8  ;;  %p1444_p6 = por %p1443_p1, %p1442_p13 }
  0x71   : > { %1168 = vmatpush3.bf16.msra.mxu1 %v1165_v14  ;;  %v1213_v0 = vpack.c.bf16 %v618_v63, %v617_v62  ;;  %v620_v2 = vld [vmem:[#allocation5 + $0x78] sm:$0xff]  ;;  %v717_v4 = vld [vmem:[#allocation7] sm:$0xff]  ;;  %v718_v5 = vld [vmem:[#allocation7 + $0x8] sm:$0xff] }
  0x72   : > { %1170 = vmatprep.subr.bf16.mxu1 %v1169_v18  ;;  %v1217_v3 = vpack.c.bf16 %v620_v2, %v619_v1  ;;  %v719_v6 = vld [vmem:[#allocation7 + $0x10] sm:$0xff]  ;;  %v1221_v7 = vpack.c.bf16 %v718_v5, %v717_v4  ;;  %v720_v8 = vld [vmem:[#allocation7 + $0x18] sm:$0xff]  ;;  %v721_v10 = vld [vmem:[#allocation7 + $0x20] sm:$0xff]  ;;  %p1445_p9 = pnand %p1444_p6, %p1438_p11 }
  0x73   : > { %1196 = vmatpush3.bf16.msra.mxu0 %v1193_v36  ;;  %v1225_v9 = vpack.c.bf16 %v720_v8, %v719_v6  ;;  %v722_v11 = vld [vmem:[#allocation7 + $0x28] sm:$0xff]  ;;  %v723_v13 = vld [vmem:[#allocation7 + $0x30] sm:$0xff]  ;;  %v724_v14 = vld [vmem:[#allocation7 + $0x38] sm:$0xff] }
  0x74   : > { %1198 = vmatprep.subr.bf16.mxu0 %v1197_v39  ;;  %v1229_v12 = vpack.c.bf16 %v722_v11, %v721_v10  ;;  %v1233_v15 = vpack.c.bf16 %v724_v14, %v723_v13  ;;  %v954_v16 = vld [vmem:[%s1802_s4] ss:$0 sm:$0xff]  ;;  %v727_v32 = vld [vmem:[#allocation7 + $0x50] sm:$0xff]  ;;  %v728_v33 = vld [vmem:[#allocation7 + $0x58] sm:$0xff] }
  0x75   : > { %1172 = vmatpush3.bf16.msra.mxu1 %v1169_v18  ;;  %v725_v29 = vld [vmem:[#allocation7 + $0x40] sm:$0xff]  ;;  %v1241_v34 = vpack.c.bf16 %v728_v33, %v727_v32  ;;  %v730_v36 = vld [vmem:[#allocation7 + $0x68] sm:$0xff]  ;;  %v731_v38 = vld [vmem:[#allocation7 + $0x70] sm:$0xff] }
  0x76   : > { %1174 = vmatprep.subr.bf16.mxu1 %v1173_v21  ;;  %v729_v35 = vld [vmem:[#allocation7 + $0x60] sm:$0xff] }
  0x77   : > { %1200 = vmatpush3.bf16.msra.mxu0 %v1197_v39  ;;  %v1245_v37 = vpack.c.bf16 %v730_v36, %v729_v35  ;;  %v732_v39 = vld [vmem:[#allocation7 + $0x78] sm:$0xff]  ;;  %v955_v41 = vld [vmem:[%s1804_s6] ss:$0 sm:$0xff] }
  0x78   : > { %1202 = vmatprep.subr.bf16.mxu0 %v1201_v42  ;;  %v1249_v40 = vpack.c.bf16 %v732_v39, %v731_v38 }
  0x79   : > { %1176 = vmatpush3.bf16.msra.mxu1 %v1173_v21 }
  0x7a   : > { %1178 = vmatprep.subr.bf16.mxu1 %v1177_v24 }
  0x7b   : > { %1204 = vmatpush3.bf16.msra.mxu0 %v1201_v42 }
  0x7c   : > { %1206 = vmatprep.subr.bf16.mxu0 %v1205_v58 }
  0x7d   : > { %1180 = vmatpush3.bf16.msra.mxu1 %v1177_v24 }
  0x7e   : > { %1182 = vmatprep.subr.bf16.mxu1 %v1181_v27 }
  0x7f   : > { %1208 = vmatpush3.bf16.msra.mxu0 %v1205_v58 }
  0x80   : > { %1210 = vmatprep.subr.bf16.mxu0 %v1209_v61 }
  0x81   : > { %1184 = vmatpush3.bf16.msra.mxu1 %v1181_v27 }
  0x82   : > { %1186 = vmatprep.subr.bf16.mxu1 %v1185_v30 }
  0x83   : > { %1212 = vmatpush3.bf16.msra.mxu0 %v1209_v61 }
  0x84   : > { %1214 = vmatprep.subr.bf16.mxu0 %v1213_v0 }
  0x85   : > { %1188 = vmatpush3.bf16.msra.mxu1 %v1185_v30  ;;  %v726_v30 = vld [vmem:[#allocation7 + $0x48] sm:$0xff] }
  0x86   : > { %1222 = vmatprep.subr.bf16.mxu1 %v1221_v7  ;;  %v1237_v31 = vpack.c.bf16 %v726_v30, %v725_v29 }
  0x87   : > { %1216 = vmatpush3.bf16.msra.mxu0 %v1213_v0 }
  0x88   : > { %1218 = vmatprep.subr.bf16.mxu0 %v1217_v3 }
  0x8b   : > { %1220 = vmatpush3.bf16.msra.mxu0 %v1217_v3 }
 0x13f   : > { %v1035_v44 = vpop.f32.mrb[0].mxu0 }
 0x140   : > { %v476_v45 = vadd.f32 %v1035_v44, %v949_v43  ;;  %v470_v46 = vpop.f32.mrb[1].mxu0 }
 0x141   : > { %v471_v47 = vadd.f32 %v949_v43, %v470_v46 }
 0x143   : > { %1327 = vtanh.f32 %v471_v47  ;;  %v1038_v48 = vpop.f32.mrb[2].mxu0 }
 0x144   : > { %1329 = vtanh.f32 %v476_v45  ;;  %v486_v49 = vadd.f32 %v1038_v48, %v949_v43  ;;  %v480_v50 = vpop.f32.mrb[3].mxu0 }
 0x145   : > { %v481_v51 = vadd.f32 %v949_v43, %v480_v50 }
 0x147   : > { %1331 = vtanh.f32 %v481_v51 }
 0x148   : > { %1333 = vtanh.f32 %v486_v49 }
 0x14d   : > { %v1328_v52 = vpop.eup %1327 }
 0x14e   : > { %v1330_v53 = vpop.eup %1329  ;;  %1071 = vmatprep.mubr.f32.mxu1 %v1328_v52 }
 0x14f   : > { %1072 = vmatmul.mubr.f32.vlgmr.msra.gmra.mrb[0].mxu1 %v1330_v53 }
 0x150   : > { %1224 = vmatpush3.bf16.msra.mxu1 %v1221_v7 }
 0x151   : > { %v1332_v54 = vpop.eup %1331  ;;  %1226 = vmatprep.subr.bf16.mxu1 %v1225_v9 }
 0x152   : > { %v1334_v55 = vpop.eup %1333  ;;  %1074 = vmatprep.mubr.f32.mxu1 %v1332_v54  ;;  %v956_v54 = vld [vmem:[%s1806_s8] ss:$0 sm:$0xff] }
 0x153   : > { %1075 = vmatmul.mubr.f32.gmra.mrb[2].mxu1 %v1334_v55 }
 0x154   : > { %1228 = vmatpush3.bf16.msra.mxu1 %v1225_v9 }
 0x155   : > { %1230 = vmatprep.subr.bf16.mxu1 %v1229_v12 }
 0x158   : > { %1232 = vmatpush3.bf16.msra.mxu1 %v1229_v12 }
 0x159   : > { %1234 = vmatprep.subr.bf16.mxu1 %v1233_v15 }
 0x15c   : > { %1236 = vmatpush3.bf16.msra.mxu1 %v1233_v15 }
 0x15d   : > { %1238 = vmatprep.subr.bf16.mxu1 %v1237_v31 }
 0x160   : > { %1240 = vmatpush3.bf16.msra.mxu1 %v1237_v31 }
 0x161   : > { %1242 = vmatprep.subr.bf16.mxu1 %v1241_v34 }
 0x164   : > { %1244 = vmatpush3.bf16.msra.mxu1 %v1241_v34 }
 0x165   : > { %1246 = vmatprep.subr.bf16.mxu1 %v1245_v37 }
 0x168   : > { %1248 = vmatpush3.bf16.msra.mxu1 %v1245_v37 }
 0x169   : > { %1250 = vmatprep.subr.bf16.mxu1 %v1249_v40 }
 0x16c   : > { %1252 = vmatpush3.bf16.msra.mxu1 %v1249_v40 }
 0x222   : > { %v1073_v17 = vpop.f32.mrb[0].mxu1 }
 0x223   : > { %v588_v18 = vadd.f32 %v1073_v17, %v954_v16  ;;  %v582_v19 = vpop.f32.mrb[1].mxu1 }
 0x224   : > { %v583_v20 = vadd.f32 %v954_v16, %v582_v19 }
 0x226   : > { %1335 = vtanh.f32 %v583_v20  ;;  %v1076_v21 = vpop.f32.mrb[2].mxu1 }
 0x227   : > { %1337 = vtanh.f32 %v588_v18  ;;  %v598_v22 = vadd.f32 %v1076_v21, %v954_v16  ;;  %v592_v23 = vpop.f32.mrb[3].mxu1 }
 0x228   : > { %v593_v24 = vadd.f32 %v954_v16, %v592_v23 }
 0x22a   : > { %1339 = vtanh.f32 %v593_v24 }
 0x22b   : > { %1341 = vtanh.f32 %v598_v22 }
 0x230   : > { %v1336_v25 = vpop.eup %1335 }
 0x231   : > { %v1338_v26 = vpop.eup %1337  ;;  %1109 = vmatprep.mubr.f32.mxu0 %v1336_v25 }
 0x232   : > { %1110 = vmatmul.mubr.f32.vlgmr.msra.gmra.mrb[4].mxu0 %v1338_v26 }
 0x234   : > { %v1340_v27 = vpop.eup %1339 }
 0x235   : > { %v1342_v28 = vpop.eup %1341  ;;  %1112 = vmatprep.mubr.f32.mxu0 %v1340_v27 }
 0x236   : > { %1113 = vmatmul.mubr.f32.gmra.mrb[6].mxu0 %v1342_v28 }
 0x305   : > { %v1111_v42 = vpop.f32.mrb[4].mxu0 }
 0x306   : > { %v700_v43 = vadd.f32 %v1111_v42, %v955_v41  ;;  %v694_v44 = vpop.f32.mrb[5].mxu0 }
 0x307   : > { %v695_v45 = vadd.f32 %v955_v41, %v694_v44 }
 0x309   : > { %1343 = vtanh.f32 %v695_v45  ;;  %v1114_v46 = vpop.f32.mrb[6].mxu0 }
 0x30a   : > { %1345 = vtanh.f32 %v700_v43  ;;  %v710_v47 = vadd.f32 %v1114_v46, %v955_v41  ;;  %v704_v48 = vpop.f32.mrb[7].mxu0 }
 0x30b   : > { %v705_v49 = vadd.f32 %v955_v41, %v704_v48 }
 0x30d   : > { %1347 = vtanh.f32 %v705_v49 }
 0x30e   : > { %1349 = vtanh.f32 %v710_v47 }
 0x313   : > { %v1344_v50 = vpop.eup %1343 }
 0x314   : > { %v1346_v51 = vpop.eup %1345  ;;  %1147 = vmatprep.mubr.f32.mxu1 %v1344_v50 }
 0x315   : > { %1148 = vmatmul.mubr.f32.vlgmr.msra.gmra.mrb[4].mxu1 %v1346_v51 }
 0x317   : > { %v1348_v52 = vpop.eup %1347 }
 0x318   : > { %v1350_v53 = vpop.eup %1349  ;;  %1150 = vmatprep.mubr.f32.mxu1 %v1348_v52 }
 0x319   : > { %1151 = vmatmul.mubr.f32.gmra.mrb[6].mxu1 %v1350_v53 }
 0x3e8   : > { %v1149_v55 = vpop.f32.mrb[4].mxu1 }
 0x3e9   : > { %v812_v56 = vadd.f32 %v1149_v55, %v956_v54  ;;  %v806_v57 = vpop.f32.mrb[5].mxu1 }
 0x3ea   : > { %v807_v58 = vadd.f32 %v956_v54, %v806_v57 }
 0x3eb   : > { %826 = vst [vmem:[%s370_s21 + $0x8] sm:$0xff] %v812_v56 }
 0x3ec   : > { %825 = vst [vmem:[%s370_s21] sm:$0xff] %v807_v58  ;;  %v1152_v59 = vpop.f32.mrb[6].mxu1 }
 0x3ed   : > { %v822_v60 = vadd.f32 %v1152_v59, %v956_v54  ;;  %v816_v61 = vpop.f32.mrb[7].mxu1 }
 0x3ee   : > { %v817_v62 = vadd.f32 %v956_v54, %v816_v61 }
 0x3ef   : > { %828 = vst [vmem:[%s370_s21 + $0x18] sm:$0xff] %v822_v60 }
 0x3f0   : > { %827 = vst [vmem:[%s370_s21 + $0x10] sm:$0xff] %v817_v62 }
 0x3f1   : > { %1448 = shalt.err (!%p1445_p9)
}
 0x3f2   : > { %s1449_s27 = scalar_lea.hbm %s1755_s15, 512  ;;  %s1453_s26 = scalar_lea.hbm %s1807_s9, 1024 }
 0x3f3   : > { %p1450_p2 = scmp.ne.s32.totalorder %s1755_s15, %s1449_s27  ;;  %p1454_p5 = scmp.lt.u32.totalorder %s1755_s15, %s1807_s9 }
 0x3f4   : > { %p1455_p10 = scmp.lt.u32.totalorder %s1453_s26, %s1449_s27  ;;  %p1457_p12 = scmp.lt.u32.totalorder %s1449_s27, %s1755_s15 }
 0x3f5   : > { %p1451_p0 = pnand %p1450_p2, %p1831_p7 }
 0x3f6   : > { %p1456_p4 = por %p1455_p10, %p1454_p5 }
 0x3f7   : > { %p1452_p3 = pneg %p1451_p0 }
 0x3f8   : > { %p1458_p8 = por %p1457_p12, %p1456_p4 }
 0x3fa   : > { %p1459_p11 = pnand %p1458_p8, %p1452_p3 }
 0x3fc   : > { %1462 = shalt.err (!%p1459_p11)
}
 0x3fd   : > { %s1513_s24 = smov 128   ;;  %s1514_s21 = smov 8  }
 0x3fe   : > { %1265 = dma.vmem_to_hbm [thread:$0]  (%p1831_p7), %s1750_s28, 512, %s1755_s15, %s1757_s20, %s1513_s24, %s1513_s24, %s1514_s21  }
 0x3ff PF: > { %s1832_s14 = sld [smem:[#allocation12_spill]]  ;;  %s1833_s16 = sld [smem:[#allocation16_spill]] }
 0x400   : > { %p1287_p13 = scmp.ge.s32.totalorder %s1505_s12, 2 }
 0x405   : > { %s858_s11 = sand.u32 1, %s1832_s14   ;;  %p1834_p1 = scmp.ne.s32.totalorder %s1833_s16, 0 }
 0x406   : > { %s859_s13 = scalar_lea.sflag [#allocation4], %s858_s11 }
 0x407   : > { %p1278_p6 = pnand %p1287_p13, %p1834_p1 }
 0x409   : > { %1488 = dma.done.wait (!%p1278_p6), %s859_s13, 512  }
 0x40a   : > { %1490 = vsyncadd (!%p1278_p6), %s859_s13, 4294966784  ;;  %s1835_s12 = sld [smem:[#allocation14_spill]]  ;;  %s1836_s17 = sld [smem:[#allocation13_spill]] }
 0x40b   : > { %s1837_s11 = sld [smem:[#allocation15_spill]]  ;;  %s1838_s30 = smov %s1497_s10 }
 0x410   : > { %p21_p9 = scmp.ge.s32.totalorder %s1835_s12, 4   ;;  %s1839_s10 = smov %s1836_s17 }
 0x412   :  { %23 = sbr.rel (!%p21_p9) target bundleno = 5 (0x5), region = 104 }
 0x419   :  { %864 = vsyncpa [#allocation3], 1 }
 0x41a   :  { %866 = vsyncpa [#allocation3 + $0x1], 1 }
 0x41b   :  { %867 = vsyncpa [#allocation6], 1 }
 0x41c   :  { %868 = vsyncpa [#allocation4], 1 }
 0x41d   :  { %870 = vsyncpa [#allocation4 + $0x1], 1 }

</bundles_post_ra>
